<compile_context>
chip_gen: v6e
topology: v6e:2x2x1
jax: 0.10.0
libtpu: 0.0.40
codegen_flags: <defaults>
</compile_context>

<pallas_src>
import functools

import jax
import jax.numpy as jnp
from jax.experimental import pallas as pl
from jax.experimental.pallas import tpu as pltpu

# ----------------------------- configuration ------------------------------
CFG = dict(
    vocab=128,      # scaled down from 50264
    d_model=64,     # scaled down from 1024
    ffn=128,        # scaled down from 4096
    heads=4,        # scaled down from 16
    enc_layers=2,   # scaled down from 12
    dec_layers=2,   # scaled down from 12
    max_pos=64,     # scaled down from 1024
)

# Conservative explicit scoped-VMEM budget (safe on v5e/v6e/v7x).
VMEM_LIMIT = 32 * 1024 * 1024

# Matmul tile targets (shrunk automatically when dims are smaller).
TM_TARGET = 256   # sublane (rows of activation)
TN_TARGET = 512   # lane    (output features)
TK_TARGET = 512   # reduction


def _pick_tile(dim, target, align):
    """Largest tile <= target that is `align`-aligned and divides dim; else full dim."""
    if dim <= target:
        return dim
    t = (target // align) * align
    while t >= align:
        if dim % t == 0:
            return t
        t -= align
    return dim


# ------------------------------ Pallas kernels ----------------------------

def _matmul_bias_kernel(x_ref, w_ref, b_ref, o_ref, acc_ref, *, activation):
    """Tiled matmul with f32 accumulator; bias (+ optional gelu) on the last K step."""
    @pl.when(pl.program_id(2) == 0)
    def _():
        acc_ref[...] = jnp.zeros_like(acc_ref)

    acc_ref[...] += jnp.dot(
        x_ref[...], w_ref[...], preferred_element_type=jnp.float32
    )

    @pl.when(pl.program_id(2) == pl.num_programs(2) - 1)
    def _():
        z = acc_ref[...] + b_ref[...]
        if activation == "gelu":
            # TODO(synk): PyTorch BART uses exact (erf) gelu; tanh approximation used here.
            z = 0.5 * z * (1.0 + jnp.tanh(0.7978845608028654 * (z + 0.044715 * z * z * z)))
        o_ref[...] = z


def _add_layernorm_kernel(x_ref, r_ref, g_ref, b_ref, o_ref):
    """Fused residual-add + LayerNorm over the hidden dim."""
    x = x_ref[...] + r_ref[...]
    mu = jnp.mean(x, axis=-1, keepdims=True)
    var = jnp.mean((x - mu) * (x - mu), axis=-1, keepdims=True)
    o_ref[...] = (x - mu) * jax.lax.rsqrt(var + 1e-5) * g_ref[...] + b_ref[...]


def _attention_kernel(q_ref, k_ref, v_ref, m_ref, wo_ref, bo_ref, o_ref,
                      *, n_heads, causal, scale):
    """Per-batch fused multi-head attention + output projection.

    Blocks: q [1,Tq,D], k/v [1,Tk,D], mask row [1,1,Tk], wo [D,D] (bf16), out [1,Tq,D].
    Masks are built in-kernel; softmax normalization uses the EUP reciprocal.
    """
    Tq, D = q_ref.shape[1], q_ref.shape[2]
    Tk = k_ref.shape[1]
    Dh = D // n_heads

    q = q_ref[0]            # [Tq, D] f32
    k = k_ref[0]            # [Tk, D] f32
    v = v_ref[0]            # [Tk, D] f32

    # Additive key-padding mask, generated in-kernel from a [1, Tk] row.
    bias = jnp.where(m_ref[0] > 0.5, 0.0, -1e9)          # [1, Tk]
    bias = jnp.broadcast_to(bias, (Tq, Tk))
    if causal:
        qi = jax.lax.broadcasted_iota(jnp.int32, (Tq, Tk), 0)
        ki = jax.lax.broadcasted_iota(jnp.int32, (Tq, Tk), 1)
        bias = bias + jnp.where(qi >= ki, 0.0, -1e9)

    outs = []
    for h in range(n_heads):
        sl = slice(h * Dh, (h + 1) * Dh)
        qh = (q[:, sl] * scale).astype(jnp.bfloat16)
        kh = k[:, sl].astype(jnp.bfloat16)
        vh = v[:, sl].astype(jnp.bfloat16)
        s = jnp.dot(qh, kh.T, preferred_element_type=jnp.float32) + bias
        s = s - jnp.max(s, axis=-1, keepdims=True)
        p = jnp.exp(s)
        p = p * pl.reciprocal(jnp.sum(p, axis=-1, keepdims=True), approx=True)
        outs.append(jnp.dot(p.astype(jnp.bfloat16), vh,
                            preferred_element_type=jnp.float32))

    ctx = jnp.concatenate(outs, axis=-1).astype(jnp.bfloat16)     # [Tq, D]
    o_ref[0] = (jnp.dot(ctx, wo_ref[...], preferred_element_type=jnp.float32)
                + bo_ref[...])


# ------------------------------ kernel wrappers ----------------------------

def matmul_bias(x2d, w, b, activation=None):
    """x2d [M,K] f32  @  w [K,N] bf16  + b [N] f32 -> [M,N] f32 (tiled, pipelined)."""
    M, K = x2d.shape
    N = w.shape[1]
    tm = _pick_tile(M, TM_TARGET, 16)
    tn = _pick_tile(N, TN_TARGET, 128)
    tk = _pick_tile(K, TK_TARGET, 128)
    grid = (M // tm, N // tn, K // tk)
    kern = functools.partial(_matmul_bias_kernel, activation=activation)
    return pl.pallas_call(
        kern,
        grid=grid,
        in_specs=[
            pl.BlockSpec((tm, tk), lambda i, j, k: (i, k)),
            pl.BlockSpec((tk, tn), lambda i, j, k: (k, j)),
            pl.BlockSpec((1, tn), lambda i, j, k: (0, j)),
        ],
        out_specs=pl.BlockSpec((tm, tn), lambda i, j, k: (i, j)),
        out_shape=jax.ShapeDtypeStruct((M, N), jnp.float32),
        scratch_shapes=[pltpu.VMEM((tm, tn), jnp.float32)],
        compiler_params=pltpu.CompilerParams(
            dimension_semantics=("parallel", "parallel", "arbitrary"),
            vmem_limit_bytes=VMEM_LIMIT),
    )(x2d.astype(jnp.bfloat16), w, b.reshape(1, N).astype(jnp.float32))


def add_layernorm(x2d, r2d, g, b):
    """LayerNorm(x + residual) over the last dim, tiled over rows."""
    M, D = x2d.shape
    tm = _pick_tile(M, 512, 8)
    return pl.pallas_call(
        _add_layernorm_kernel,
        grid=(M // tm,),
        in_specs=[
            pl.BlockSpec((tm, D), lambda i: (i, 0)),
            pl.BlockSpec((tm, D), lambda i: (i, 0)),
            pl.BlockSpec((1, D), lambda i: (0, 0)),
            pl.BlockSpec((1, D), lambda i: (0, 0)),
        ],
        out_specs=pl.BlockSpec((tm, D), lambda i: (i, 0)),
        out_shape=jax.ShapeDtypeStruct((M, D), jnp.float32),
        compiler_params=pltpu.CompilerParams(
            dimension_semantics=("parallel",),
            vmem_limit_bytes=VMEM_LIMIT),
    )(x2d, r2d, g.reshape(1, D), b.reshape(1, D))


def attention(q, k, v, kv_mask, wo, bo, n_heads, causal):
    """q [B,Tq,D], k/v [B,Tk,D], kv_mask [B,1,Tk] -> [B,Tq,D] (out-proj fused)."""
    B, Tq, D = q.shape
    Tk = k.shape[1]
    scale = float((D // n_heads) ** -0.5)
    kern = functools.partial(_attention_kernel, n_heads=n_heads,
                             causal=causal, scale=scale)
    return pl.pallas_call(
        kern,
        grid=(B,),
        in_specs=[
            pl.BlockSpec((1, Tq, D), lambda b: (b, 0, 0)),
            pl.BlockSpec((1, Tk, D), lambda b: (b, 0, 0)),
            pl.BlockSpec((1, Tk, D), lambda b: (b, 0, 0)),
            pl.BlockSpec((1, 1, Tk), lambda b: (b, 0, 0)),
            pl.BlockSpec((D, D), lambda b: (0, 0)),
            pl.BlockSpec((1, D), lambda b: (0, 0)),
        ],
        out_specs=pl.BlockSpec((1, Tq, D), lambda b: (b, 0, 0)),
        out_shape=jax.ShapeDtypeStruct((B, Tq, D), jnp.float32),
        compiler_params=pltpu.CompilerParams(
            dimension_semantics=("parallel",),
            vmem_limit_bytes=VMEM_LIMIT),
    )(q, k, v, kv_mask, wo, bo.reshape(1, D).astype(jnp.float32))


# ------------------------------- model pieces ------------------------------

def encoder_layer(x, p, kv_mask, n_heads):
    B, T, D = x.shape
    x2 = x.reshape(B * T, D)

    qkv = matmul_bias(x2, p["sa_qkv_w"], p["sa_qkv_b"]).reshape(B, T, 3 * D)
    q, k, v = qkv[..., :D], qkv[..., D:2 * D], qkv[..., 2 * D:]
    a = attention(q, k, v, kv_mask, p["sa_o_w"], p["sa_o_b"], n_heads, causal=False)
    h = add_layernorm(a.reshape(B * T, D), x2, p["sa_ln_g"], p["sa_ln_b"])

    f = matmul_bias(h, p["fc1_w"], p["fc1_b"], activation="gelu")
    f = matmul_bias(f, p["fc2_w"], p["fc2_b"])
    h = add_layernorm(f, h, p["fin_ln_g"], p["fin_ln_b"])
    return h.reshape(B, T, D)


def decoder_layer(x, enc_h, p, enc_kv_mask, dec_kv_mask, n_heads):
    B, T, D = x.shape
    S = enc_h.shape[1]
    x2 = x.reshape(B * T, D)

    # causal self-attention
    qkv = matmul_bias(x2, p["sa_qkv_w"], p["sa_qkv_b"]).reshape(B, T, 3 * D)
    q, k, v = qkv[..., :D], qkv[..., D:2 * D], qkv[..., 2 * D:]
    a = attention(q, k, v, dec_kv_mask, p["sa_o_w"], p["sa_o_b"], n_heads, causal=True)
    h = add_layernorm(a.reshape(B * T, D), x2, p["sa_ln_g"], p["sa_ln_b"])

    # cross-attention over encoder states (K/V fused projection)
    q = matmul_bias(h, p["ca_q_w"], p["ca_q_b"]).reshape(B, T, D)
    kv = matmul_bias(enc_h.reshape(B * S, D), p["ca_kv_w"], p["ca_kv_b"]).reshape(B, S, 2 * D)
    k, v = kv[..., :D], kv[..., D:]
    c = attention(q, k, v, enc_kv_mask, p["ca_o_w"], p["ca_o_b"], n_heads, causal=False)
    h = add_layernorm(c.reshape(B * T, D), h, p["ca_ln_g"], p["ca_ln_b"])

    # FFN
    f = matmul_bias(h, p["fc1_w"], p["fc1_b"], activation="gelu")
    f = matmul_bias(f, p["fc2_w"], p["fc2_b"])
    h = add_layernorm(f, h, p["fin_ln_g"], p["fin_ln_b"])
    return h.reshape(B, T, D)


def encode(params, input_ids, attention_mask):
    B, S = input_ids.shape
    D = CFG["d_model"]
    tok = jnp.take(params["embed_tokens"], input_ids, axis=0)   # scale_embedding=False
    pos = jnp.broadcast_to(params["enc_pos"][2:2 + S][None], (B, S, D))  # offset 2
    x = add_layernorm(tok.reshape(B * S, D), pos.reshape(B * S, D),
                      params["enc_ln_emb_g"], params["enc_ln_emb_b"]).reshape(B, S, D)

    kv_mask = attention_mask.astype(jnp.float32).reshape(B, 1, S)
    for lp in params["enc_layers"]:
        x = encoder_layer(x, lp, kv_mask, CFG["heads"])
    return x


def decode(params, decoder_input_ids, enc_hidden, enc_attention_mask):
    B, T = decoder_input_ids.shape
    S = enc_hidden.shape[1]
    D = CFG["d_model"]
    tok = jnp.take(params["embed_tokens"], decoder_input_ids, axis=0)
    pos = jnp.broadcast_to(params["dec_pos"][2:2 + T][None], (B, T, D))
    x = add_layernorm(tok.reshape(B * T, D), pos.reshape(B * T, D),
                      params["dec_ln_emb_g"], params["dec_ln_emb_b"]).reshape(B, T, D)

    enc_kv_mask = enc_attention_mask.astype(jnp.float32).reshape(B, 1, S)
    dec_kv_mask = jnp.ones((B, 1, T), jnp.float32)   # decoder mask is causal-only
    for lp in params["dec_layers"]:
        x = decoder_layer(x, enc_hidden, lp, enc_kv_mask, dec_kv_mask, CFG["heads"])
    return x


def forward(params, input_ids, attention_mask, decoder_input_ids):
    enc_out = encode(params, input_ids, attention_mask)
    dec_out = decode(params, decoder_input_ids, enc_out, attention_mask)

    B, T, D = dec_out.shape
    # lm_head: tied weight (pre-transposed once, bf16) + final_logits_bias
    logits = matmul_bias(
        dec_out.reshape(B * T, D), params["lm_head_w"], params["final_logits_bias"]
    ).reshape(B, T, CFG["vocab"])

    # Pointer generator in plain JAX: output lane width is 1, so a dedicated
    # Pallas kernel would be pure launch/layout overhead.
    concat = jnp.concatenate([dec_out[:, -1, :], enc_out[:, 0, :]], axis=-1)
    p_gen = jax.nn.sigmoid(concat @ params["ptr_w"] + params["ptr_b"])
    return logits, p_gen


# ------------------------------- parameter init ----------------------------

def _dense(key, fan_in, fan_out):
    # Weights are stored bf16 (MXU-native); biases / LN params stay f32.
    return (0.02 * jax.random.normal(key, (fan_in, fan_out), jnp.float32)).astype(jnp.bfloat16)


def _init_enc_layer(key, d, f):
    ks = jax.random.split(key, 4)
    return {
        "sa_qkv_w": _dense(ks[0], d, 3 * d), "sa_qkv_b": jnp.zeros((3 * d,), jnp.float32),
        "sa_o_w": _dense(ks[1], d, d), "sa_o_b": jnp.zeros((d,), jnp.float32),
        "sa_ln_g": jnp.ones((d,), jnp.float32), "sa_ln_b": jnp.zeros((d,), jnp.float32),
        "fc1_w": _dense(ks[2], d, f), "fc1_b": jnp.zeros((f,), jnp.float32),
        "fc2_w": _dense(ks[3], f, d), "fc2_b": jnp.zeros((d,), jnp.float32),
        "fin_ln_g": jnp.ones((d,), jnp.float32), "fin_ln_b": jnp.zeros((d,), jnp.float32),
    }


def _init_dec_layer(key, d, f):
    ks = jax.random.split(key, 4)
    p = _init_enc_layer(ks[0], d, f)
    p.update({
        "ca_q_w": _dense(ks[1], d, d), "ca_q_b": jnp.zeros((d,), jnp.float32),
        "ca_kv_w": _dense(ks[2], d, 2 * d), "ca_kv_b": jnp.zeros((2 * d,), jnp.float32),
        "ca_o_w": _dense(ks[3], d, d), "ca_o_b": jnp.zeros((d,), jnp.float32),
        "ca_ln_g": jnp.ones((d,), jnp.float32), "ca_ln_b": jnp.zeros((d,), jnp.float32),
    })
    return p


def init_params(key):
    d, f, v, mp = CFG["d_model"], CFG["ffn"], CFG["vocab"], CFG["max_pos"]
    ks = jax.random.split(key, 4 + CFG["enc_layers"] + CFG["dec_layers"])
    embed = 0.02 * jax.random.normal(ks[0], (v, d), jnp.float32)
    params = {
        "embed_tokens": embed,                          # f32 for the embedding gather
        "lm_head_w": embed.T.astype(jnp.bfloat16),      # tied lm_head, pre-transposed once
        "enc_pos": 0.02 * jax.random.normal(ks[1], (mp + 2, d), jnp.float32),
        "dec_pos": 0.02 * jax.random.normal(ks[2], (mp + 2, d), jnp.float32),
        "enc_ln_emb_g": jnp.ones((d,), jnp.float32),
        "enc_ln_emb_b": jnp.zeros((d,), jnp.float32),
        "dec_ln_emb_g": jnp.ones((d,), jnp.float32),
        "dec_ln_emb_b": jnp.zeros((d,), jnp.float32),
        "final_logits_bias": jnp.zeros((v,), jnp.float32),
        "ptr_w": 0.02 * jax.random.normal(ks[3], (2 * d, 1), jnp.float32),
        "ptr_b": jnp.zeros((1,), jnp.float32),
    }
    params["enc_layers"] = [
        _init_enc_layer(ks[4 + i], d, f) for i in range(CFG["enc_layers"])
    ]
    params["dec_layers"] = [
        _init_dec_layer(ks[4 + CFG["enc_layers"] + i], d, f)
        for i in range(CFG["dec_layers"])
    ]
    return params


# ------------------------------------ main ---------------------------------

if __name__ == "__main__":
    key = jax.random.PRNGKey(0)
    pkey, ik1, ik2 = jax.random.split(key, 3)
    params = init_params(pkey)

    B, S, T = 2, 8, 8
    input_ids = jax.random.randint(ik1, (B, S), 0, CFG["vocab"], dtype=jnp.int32)
    decoder_input_ids = jax.random.randint(ik2, (B, T), 0, CFG["vocab"], dtype=jnp.int32)
    # second sequence has two padding positions to exercise the encoder mask
    attention_mask = jnp.array(
        [[1, 1, 1, 1, 1, 1, 1, 1], [1, 1, 1, 1, 1, 1, 0, 0]], dtype=jnp.int32
    )

    fwd = jax.jit(forward)
    logits, p_gen = fwd(params, input_ids, attention_mask, decoder_input_ids)
    jax.block_until_ready((logits, p_gen))

    assert logits.shape == (B, T, CFG["vocab"])
    assert p_gen.shape == (B, 1)
    print("KERNEL_OK")
</pallas_src>

<mosaic_0001>
module attributes {stable_mosaic.version = 11 : i64} {
  func.func @_add_layernorm_kernel(%arg0: i32, %arg1: memref<16x64xf32, #tpu.memory_space<vmem>>, %arg2: memref<16x64xf32, #tpu.memory_space<vmem>>, %arg3: memref<1x64xf32, #tpu.memory_space<vmem>>, %arg4: memref<1x64xf32, #tpu.memory_space<vmem>>, %arg5: memref<16x64xf32, #tpu.memory_space<vmem>>) attributes {dimension_semantics = [#tpu.dimension_semantics<parallel>], iteration_bounds = array<i64: 1>, scalar_prefetch = 0 : i64, scratch_operands = 0 : i64, tpu.core_type = #tpu.core_type<tc>, window_params = [{transform_indices = @transform_0, window_bounds = array<i64: 16, 64>}, {transform_indices = @transform_1, window_bounds = array<i64: 16, 64>}, {pipeline_mode = #tpu.pipeline_mode<synchronous>, transform_indices = @transform_2, window_bounds = array<i64: 1, 64>}, {pipeline_mode = #tpu.pipeline_mode<synchronous>, transform_indices = @transform_3, window_bounds = array<i64: 1, 64>}, {transform_indices = @transform_4, window_bounds = array<i64: 16, 64>}]} {
    %c0 = arith.constant 0 : index
    %c0_0 = arith.constant 0 : index
    %0 = vector.load %arg1[%c0, %c0_0] : memref<16x64xf32, #tpu.memory_space<vmem>>, vector<16x64xf32>
    %c0_1 = arith.constant 0 : index
    %c0_2 = arith.constant 0 : index
    %1 = vector.load %arg2[%c0_1, %c0_2] : memref<16x64xf32, #tpu.memory_space<vmem>>, vector<16x64xf32>
    %2 = arith.addf %0, %1 : vector<16x64xf32>
    %cst = arith.constant dense<0.000000e+00> : vector<16xf32>
    %3 = vector.multi_reduction <add>, %2, %cst [1] : vector<16x64xf32> to vector<16xf32>
    %4 = vector.shape_cast %3 : vector<16xf32> to vector<16x1xf32>
    %cst_3 = arith.constant 6.400000e+01 : f32
    %5 = vector.broadcast %cst_3 : f32 to vector<16x1xf32>
    %6 = arith.divf %4, %5 : vector<16x1xf32>
    %7 = vector.broadcast %6 : vector<16x1xf32> to vector<16x64xf32>
    %8 = arith.subf %2, %7 : vector<16x64xf32>
    %9 = vector.broadcast %6 : vector<16x1xf32> to vector<16x64xf32>
    %10 = arith.subf %2, %9 : vector<16x64xf32>
    %11 = arith.mulf %8, %10 : vector<16x64xf32>
    %cst_4 = arith.constant dense<0.000000e+00> : vector<16xf32>
    %12 = vector.multi_reduction <add>, %11, %cst_4 [1] : vector<16x64xf32> to vector<16xf32>
    %13 = vector.shape_cast %12 : vector<16xf32> to vector<16x1xf32>
    %cst_5 = arith.constant 6.400000e+01 : f32
    %14 = vector.broadcast %cst_5 : f32 to vector<16x1xf32>
    %15 = arith.divf %13, %14 : vector<16x1xf32>
    %16 = vector.broadcast %6 : vector<16x1xf32> to vector<16x64xf32>
    %17 = arith.subf %2, %16 : vector<16x64xf32>
    %cst_6 = arith.constant 9.99999974E-6 : f32
    %18 = vector.broadcast %cst_6 : f32 to vector<16x1xf32>
    %19 = arith.addf %15, %18 : vector<16x1xf32>
    %20 = math.rsqrt %19 : vector<16x1xf32>
    %21 = vector.broadcast %20 : vector<16x1xf32> to vector<16x64xf32>
    %22 = arith.mulf %17, %21 : vector<16x64xf32>
    %c0_7 = arith.constant 0 : index
    %c0_8 = arith.constant 0 : index
    %23 = vector.load %arg3[%c0_7, %c0_8] : memref<1x64xf32, #tpu.memory_space<vmem>>, vector<1x64xf32>
    %24 = vector.broadcast %23 : vector<1x64xf32> to vector<16x64xf32>
    %25 = arith.mulf %22, %24 : vector<16x64xf32>
    %c0_9 = arith.constant 0 : index
    %c0_10 = arith.constant 0 : index
    %26 = vector.load %arg4[%c0_9, %c0_10] : memref<1x64xf32, #tpu.memory_space<vmem>>, vector<1x64xf32>
    %27 = vector.broadcast %26 : vector<1x64xf32> to vector<16x64xf32>
    %28 = arith.addf %25, %27 : vector<16x64xf32>
    %c0_11 = arith.constant 0 : index
    %c0_12 = arith.constant 0 : index
    %29 = vector.load %arg5[%c0_11, %c0_12] : memref<16x64xf32, #tpu.memory_space<vmem>>, vector<16x64xf32>
    tpu.vector_store %arg5[%c0_11, %c0_12], %28 {strides = array<i32>} : memref<16x64xf32, #tpu.memory_space<vmem>>, vector<16x64xf32>,
    return
  }
  func.func @transform_0(%arg0: i32) -> (i32, i32) {
    %c0_i32 = arith.constant 0 : i32
    %c0_i32_0 = arith.constant 0 : i32
    return %arg0, %c0_i32 : i32, i32
  }
  func.func @transform_1(%arg0: i32) -> (i32, i32) {
    %c0_i32 = arith.constant 0 : i32
    %c0_i32_0 = arith.constant 0 : i32
    return %arg0, %c0_i32 : i32, i32
  }
  func.func @transform_2(%arg0: i32) -> (i32, i32) {
    %c0_i32 = arith.constant 0 : i32
    %c0_i32_0 = arith.constant 0 : i32
    %c0_i32_1 = arith.constant 0 : i32
    return %c0_i32, %c0_i32_0 : i32, i32
  }
  func.func @transform_3(%arg0: i32) -> (i32, i32) {
    %c0_i32 = arith.constant 0 : i32
    %c0_i32_0 = arith.constant 0 : i32
    %c0_i32_1 = arith.constant 0 : i32
    return %c0_i32, %c0_i32_0 : i32, i32
  }
  func.func @transform_4(%arg0: i32) -> (i32, i32) {
    %c0_i32 = arith.constant 0 : i32
    %c0_i32_0 = arith.constant 0 : i32
    return %arg0, %c0_i32 : i32, i32
  }
}

module attributes {stable_mosaic.version = 11 : i64} {
  func.func @_matmul_bias_kernel(%arg0: i32, %arg1: i32, %arg2: i32, %arg3: memref<16x64xbf16, #tpu.memory_space<vmem>>, %arg4: memref<64x192xbf16, #tpu.memory_space<vmem>>, %arg5: memref<1x192xf32, #tpu.memory_space<vmem>>, %arg6: memref<16x192xf32, #tpu.memory_space<vmem>>, %arg7: memref<16x192xf32, #tpu.memory_space<vmem>>) attributes {dimension_semantics = [#tpu.dimension_semantics<parallel>, #tpu.dimension_semantics<parallel>, #tpu.dimension_semantics<arbitrary>], iteration_bounds = array<i64: 1, 1, 1>, scalar_prefetch = 0 : i64, scratch_operands = 1 : i64, tpu.core_type = #tpu.core_type<tc>, window_params = [{transform_indices = @transform_0, window_bounds = array<i64: 16, 64>}, {transform_indices = @transform_1, window_bounds = array<i64: 64, 192>}, {transform_indices = @transform_2, window_bounds = array<i64: 1, 192>}, {transform_indices = @transform_3, window_bounds = array<i64: 16, 192>}]} {
    %c0_i32 = arith.constant 0 : i32
    %0 = arith.cmpi eq, %arg2, %c0_i32 : i32
    %1 = arith.extui %0 : i1 to i32
    %c0_i32_0 = arith.constant 0 : i32
    %2 = arith.cmpi ne, %1, %c0_i32_0 : i32
    scf.if %2 {
      %cst_10 = arith.constant 0.000000e+00 : f32
      %12 = vector.broadcast %cst_10 : f32 to vector<16x192xf32>
      %c0_11 = arith.constant 0 : index
      %c0_12 = arith.constant 0 : index
      %13 = vector.load %arg7[%c0_11, %c0_12] : memref<16x192xf32, #tpu.memory_space<vmem>>, vector<16x192xf32>
      tpu.vector_store %arg7[%c0_11, %c0_12], %12 {strides = array<i32>} : memref<16x192xf32, #tpu.memory_space<vmem>>, vector<16x192xf32>,
    } else {
    }
    %c0 = arith.constant 0 : index
    %c0_1 = arith.constant 0 : index
    %3 = vector.load %arg7[%c0, %c0_1] : memref<16x192xf32, #tpu.memory_space<vmem>>, vector<16x192xf32>
    %c0_2 = arith.constant 0 : index
    %c0_3 = arith.constant 0 : index
    %4 = vector.load %arg3[%c0_2, %c0_3] : memref<16x64xbf16, #tpu.memory_space<vmem>>, vector<16x64xbf16>
    %c0_4 = arith.constant 0 : index
    %c0_5 = arith.constant 0 : index
    %5 = vector.load %arg4[%c0_4, %c0_5] : memref<64x192xbf16, #tpu.memory_space<vmem>>, vector<64x192xbf16>
    %cst = arith.constant dense<0.000000e+00> : vector<16x192xf32>
    %6 = tpu.matmul %4, %5, %cst {dimension_numbers = #tpu.dot_dimension_numbers<[1], [0], [0], [1], [0, 0, 1, 1], [], []>} : vector<16x64xbf16>, vector<64x192xbf16>, vector<16x192xf32> -> vector<16x192xf32>
    %7 = arith.addf %3, %6 : vector<16x192xf32>
    %c0_6 = arith.constant 0 : index
    %c0_7 = arith.constant 0 : index
    %8 = vector.load %arg7[%c0_6, %c0_7] : memref<16x192xf32, #tpu.memory_space<vmem>>, vector<16x192xf32>
    tpu.vector_store %arg7[%c0_6, %c0_7], %7 {strides = array<i32>} : memref<16x192xf32, #tpu.memory_space<vmem>>, vector<16x192xf32>,
    %c0_i32_8 = arith.constant 0 : i32
    %9 = arith.cmpi eq, %arg2, %c0_i32_8 : i32
    %10 = arith.extui %9 : i1 to i32
    %c0_i32_9 = arith.constant 0 : i32
    %11 = arith.cmpi ne, %10, %c0_i32_9 : i32
    scf.if %11 {
      %c0_10 = arith.constant 0 : index
      %c0_11 = arith.constant 0 : index
      %12 = vector.load %arg7[%c0_10, %c0_11] : memref<16x192xf32, #tpu.memory_space<vmem>>, vector<16x192xf32>
      %c0_12 = arith.constant 0 : index
      %c0_13 = arith.constant 0 : index
      %13 = vector.load %arg5[%c0_12, %c0_13] : memref<1x192xf32, #tpu.memory_space<vmem>>, vector<1x192xf32>
      %14 = vector.broadcast %13 : vector<1x192xf32> to vector<16x192xf32>
      %15 = arith.addf %12, %14 : vector<16x192xf32>
      %c0_14 = arith.constant 0 : index
      %c0_15 = arith.constant 0 : index
      %16 = vector.load %arg6[%c0_14, %c0_15] : memref<16x192xf32, #tpu.memory_space<vmem>>, vector<16x192xf32>
      tpu.vector_store %arg6[%c0_14, %c0_15], %15 {strides = array<i32>} : memref<16x192xf32, #tpu.memory_space<vmem>>, vector<16x192xf32>,
    } else {
    }
    return
  }
  func.func @transform_0(%arg0: i32, %arg1: i32, %arg2: i32) -> (i32, i32) {
    %c0_i32 = arith.constant 0 : i32
    return %arg0, %arg2 : i32, i32
  }
  func.func @transform_1(%arg0: i32, %arg1: i32, %arg2: i32) -> (i32, i32) {
    %c0_i32 = arith.constant 0 : i32
    return %arg2, %arg1 : i32, i32
  }
  func.func @transform_2(%arg0: i32, %arg1: i32, %arg2: i32) -> (i32, i32) {
    %c0_i32 = arith.constant 0 : i32
    %c0_i32_0 = arith.constant 0 : i32
    return %c0_i32, %arg1 : i32, i32
  }
  func.func @transform_3(%arg0: i32, %arg1: i32, %arg2: i32) -> (i32, i32) {
    %c0_i32 = arith.constant 0 : i32
    return %arg0, %arg1 : i32, i32
  }
}

module attributes {stable_mosaic.version = 11 : i64} {
  func.func @_attention_kernel(%arg0: i32, %arg1: memref<1x8x64xf32, #tpu.memory_space<vmem>>, %arg2: memref<1x8x64xf32, #tpu.memory_space<vmem>>, %arg3: memref<1x8x64xf32, #tpu.memory_space<vmem>>, %arg4: memref<1x1x8xf32, #tpu.memory_space<vmem>>, %arg5: memref<64x64xbf16, #tpu.memory_space<vmem>>, %arg6: memref<1x64xf32, #tpu.memory_space<vmem>>, %arg7: memref<1x8x64xf32, #tpu.memory_space<vmem>>) attributes {dimension_semantics = [#tpu.dimension_semantics<parallel>], iteration_bounds = array<i64: 2>, scalar_prefetch = 0 : i64, scratch_operands = 0 : i64, tpu.core_type = #tpu.core_type<tc>, window_params = [{transform_indices = @transform_0, window_bounds = array<i64: 1, 8, 64>}, {transform_indices = @transform_1, window_bounds = array<i64: 1, 8, 64>}, {transform_indices = @transform_2, window_bounds = array<i64: 1, 8, 64>}, {transform_indices = @transform_3, window_bounds = array<i64: 1, 1, 8>}, {pipeline_mode = #tpu.pipeline_mode<synchronous>, transform_indices = @transform_4, window_bounds = array<i64: 64, 64>}, {pipeline_mode = #tpu.pipeline_mode<synchronous>, transform_indices = @transform_5, window_bounds = array<i64: 1, 64>}, {transform_indices = @transform_6, window_bounds = array<i64: 1, 8, 64>}]} {
    %c0 = arith.constant 0 : index
    %c0_0 = arith.constant 0 : index
    %c0_1 = arith.constant 0 : index
    %0 = vector.load %arg1[%c0, %c0_0, %c0_1] : memref<1x8x64xf32, #tpu.memory_space<vmem>>, vector<1x8x64xf32>
    %1 = vector.shape_cast %0 : vector<1x8x64xf32> to vector<8x64xf32>
    %c0_2 = arith.constant 0 : index
    %c0_3 = arith.constant 0 : index
    %c0_4 = arith.constant 0 : index
    %2 = vector.load %arg2[%c0_2, %c0_3, %c0_4] : memref<1x8x64xf32, #tpu.memory_space<vmem>>, vector<1x8x64xf32>
    %3 = vector.shape_cast %2 : vector<1x8x64xf32> to vector<8x64xf32>
    %c0_5 = arith.constant 0 : index
    %c0_6 = arith.constant 0 : index
    %c0_7 = arith.constant 0 : index
    %4 = vector.load %arg3[%c0_5, %c0_6, %c0_7] : memref<1x8x64xf32, #tpu.memory_space<vmem>>, vector<1x8x64xf32>
    %5 = vector.shape_cast %4 : vector<1x8x64xf32> to vector<8x64xf32>
    %c0_8 = arith.constant 0 : index
    %c0_9 = arith.constant 0 : index
    %c0_10 = arith.constant 0 : index
    %6 = vector.load %arg4[%c0_8, %c0_9, %c0_10] : memref<1x1x8xf32, #tpu.memory_space<vmem>>, vector<1x1x8xf32>
    %7 = vector.shape_cast %6 : vector<1x1x8xf32> to vector<1x8xf32>
    %cst = arith.constant 5.000000e-01 : f32
    %8 = vector.broadcast %cst : f32 to vector<1x8xf32>
    %9 = arith.cmpf ogt, %7, %8 : vector<1x8xf32>
    %cst_11 = arith.constant 0.000000e+00 : f32
    %cst_12 = arith.constant -1.000000e+09 : f32
    %10 = vector.broadcast %cst_11 : f32 to vector<1x8xf32>
    %11 = vector.broadcast %cst_12 : f32 to vector<1x8xf32>
    %12 = arith.select %9, %10, %11 : vector<1x8xi1>, vector<1x8xf32>
    %13 = vector.shape_cast %12 : vector<1x8xf32> to vector<1x8xf32>
    %14 = vector.broadcast %13 : vector<1x8xf32> to vector<8x8xf32>
    %15 = tpu.iota {dimensions = array<i32: 0>} : vector<8x8xi32>
    %16 = tpu.iota {dimensions = array<i32: 1>} : vector<8x8xi32>
    %17 = arith.cmpi sge, %15, %16 : vector<8x8xi32>
    %cst_13 = arith.constant 0.000000e+00 : f32
    %cst_14 = arith.constant -1.000000e+09 : f32
    %18 = vector.broadcast %cst_13 : f32 to vector<8x8xf32>
    %19 = vector.broadcast %cst_14 : f32 to vector<8x8xf32>
    %20 = arith.select %17, %18, %19 : vector<8x8xi1>, vector<8x8xf32>
    %21 = arith.addf %14, %20 : vector<8x8xf32>
    %22 = vector.extract_strided_slice %1 {offsets = [0, 0], sizes = [8, 16], strides = [1, 1]} : vector<8x64xf32> to vector<8x16xf32>
    %cst_15 = arith.constant 2.500000e-01 : f32
    %23 = vector.broadcast %cst_15 : f32 to vector<8x16xf32>
    %24 = arith.mulf %22, %23 : vector<8x16xf32>
    %25 = arith.truncf %24 : vector<8x16xf32> to vector<8x16xbf16>
    %26 = vector.extract_strided_slice %3 {offsets = [0, 0], sizes = [8, 16], strides = [1, 1]} : vector<8x64xf32> to vector<8x16xf32>
    %27 = arith.truncf %26 : vector<8x16xf32> to vector<8x16xbf16>
    %28 = vector.extract_strided_slice %5 {offsets = [0, 0], sizes = [8, 16], strides = [1, 1]} : vector<8x64xf32> to vector<8x16xf32>
    %29 = arith.truncf %28 : vector<8x16xf32> to vector<8x16xbf16>
    %30 = tpu.transpose %27, [1, 0] : vector<8x16xbf16> -> vector<16x8xbf16>
    %cst_16 = arith.constant dense<0.000000e+00> : vector<8x8xf32>
    %31 = tpu.matmul %25, %30, %cst_16 {dimension_numbers = #tpu.dot_dimension_numbers<[1], [0], [0], [1], [0, 0, 1, 1], [], []>} : vector<8x16xbf16>, vector<16x8xbf16>, vector<8x8xf32> -> vector<8x8xf32>
    %32 = arith.addf %31, %21 : vector<8x8xf32>
    %cst_17 = arith.constant dense<0xFF800000> : vector<8xf32>
    %33 = vector.multi_reduction <maximumf>, %32, %cst_17 [1] : vector<8x8xf32> to vector<8xf32>
    %34 = vector.shape_cast %33 : vector<8xf32> to vector<8x1xf32>
    %35 = vector.broadcast %34 : vector<8x1xf32> to vector<8x8xf32>
    %36 = arith.subf %32, %35 : vector<8x8xf32>
    %37 = math.exp %36 : vector<8x8xf32>
    %cst_18 = arith.constant dense<0.000000e+00> : vector<8xf32>
    %38 = vector.multi_reduction <add>, %37, %cst_18 [1] : vector<8x8xf32> to vector<8xf32>
    %39 = vector.shape_cast %38 : vector<8xf32> to vector<8x1xf32>
    %40 = tpu.reciprocal %39 {approx = true} : vector<8x1xf32> -> vector<8x1xf32>
    %41 = vector.broadcast %40 : vector<8x1xf32> to vector<8x8xf32>
    %42 = arith.mulf %37, %41 : vector<8x8xf32>
    %43 = arith.truncf %42 : vector<8x8xf32> to vector<8x8xbf16>
    %cst_19 = arith.constant dense<0.000000e+00> : vector<8x16xf32>
    %44 = tpu.matmul %43, %29, %cst_19 {dimension_numbers = #tpu.dot_dimension_numbers<[1], [0], [0], [1], [0, 0, 1, 1], [], []>} : vector<8x8xbf16>, vector<8x16xbf16>, vector<8x16xf32> -> vector<8x16xf32>
    %45 = vector.extract_strided_slice %1 {offsets = [0, 16], sizes = [8, 16], strides = [1, 1]} : vector<8x64xf32> to vector<8x16xf32>
    %cst_20 = arith.constant 2.500000e-01 : f32
    %46 = vector.broadcast %cst_20 : f32 to vector<8x16xf32>
    %47 = arith.mulf %45, %46 : vector<8x16xf32>
    %48 = arith.truncf %47 : vector<8x16xf32> to vector<8x16xbf16>
    %49 = vector.extract_strided_slice %3 {offsets = [0, 16], sizes = [8, 16], strides = [1, 1]} : vector<8x64xf32> to vector<8x16xf32>
    %50 = arith.truncf %49 : vector<8x16xf32> to vector<8x16xbf16>
    %51 = vector.extract_strided_slice %5 {offsets = [0, 16], sizes = [8, 16], strides = [1, 1]} : vector<8x64xf32> to vector<8x16xf32>
    %52 = arith.truncf %51 : vector<8x16xf32> to vector<8x16xbf16>
    %53 = tpu.transpose %50, [1, 0] : vector<8x16xbf16> -> vector<16x8xbf16>
    %cst_21 = arith.constant dense<0.000000e+00> : vector<8x8xf32>
    %54 = tpu.matmul %48, %53, %cst_21 {dimension_numbers = #tpu.dot_dimension_numbers<[1], [0], [0], [1], [0, 0, 1, 1], [], []>} : vector<8x16xbf16>, vector<16x8xbf16>, vector<8x8xf32> -> vector<8x8xf32>
    %55 = arith.addf %54, %21 : vector<8x8xf32>
    %cst_22 = arith.constant dense<0xFF800000> : vector<8xf32>
    %56 = vector.multi_reduction <maximumf>, %55, %cst_22 [1] : vector<8x8xf32> to vector<8xf32>
    %57 = vector.shape_cast %56 : vector<8xf32> to vector<8x1xf32>
    %58 = vector.broadcast %57 : vector<8x1xf32> to vector<8x8xf32>
    %59 = arith.subf %55, %58 : vector<8x8xf32>
    %60 = math.exp %59 : vector<8x8xf32>
    %cst_23 = arith.constant dense<0.000000e+00> : vector<8xf32>
    %61 = vector.multi_reduction <add>, %60, %cst_23 [1] : vector<8x8xf32> to vector<8xf32>
    %62 = vector.shape_cast %61 : vector<8xf32> to vector<8x1xf32>
    %63 = tpu.reciprocal %62 {approx = true} : vector<8x1xf32> -> vector<8x1xf32>
    %64 = vector.broadcast %63 : vector<8x1xf32> to vector<8x8xf32>
    %65 = arith.mulf %60, %64 : vector<8x8xf32>
    %66 = arith.truncf %65 : vector<8x8xf32> to vector<8x8xbf16>
    %cst_24 = arith.constant dense<0.000000e+00> : vector<8x16xf32>
    %67 = tpu.matmul %66, %52, %cst_24 {dimension_numbers = #tpu.dot_dimension_numbers<[1], [0], [0], [1], [0, 0, 1, 1], [], []>} : vector<8x8xbf16>, vector<8x16xbf16>, vector<8x16xf32> -> vector<8x16xf32>
    %68 = vector.extract_strided_slice %1 {offsets = [0, 32], sizes = [8, 16], strides = [1, 1]} : vector<8x64xf32> to vector<8x16xf32>
    %cst_25 = arith.constant 2.500000e-01 : f32
    %69 = vector.broadcast %cst_25 : f32 to vector<8x16xf32>
    %70 = arith.mulf %68, %69 : vector<8x16xf32>
    %71 = arith.truncf %70 : vector<8x16xf32> to vector<8x16xbf16>
    %72 = vector.extract_strided_slice %3 {offsets = [0, 32], sizes = [8, 16], strides = [1, 1]} : vector<8x64xf32> to vector<8x16xf32>
    %73 = arith.truncf %72 : vector<8x16xf32> to vector<8x16xbf16>
    %74 = vector.extract_strided_slice %5 {offsets = [0, 32], sizes = [8, 16], strides = [1, 1]} : vector<8x64xf32> to vector<8x16xf32>
    %75 = arith.truncf %74 : vector<8x16xf32> to vector<8x16xbf16>
    %76 = tpu.transpose %73, [1, 0] : vector<8x16xbf16> -> vector<16x8xbf16>
    %cst_26 = arith.constant dense<0.000000e+00> : vector<8x8xf32>
    %77 = tpu.matmul %71, %76, %cst_26 {dimension_numbers = #tpu.dot_dimension_numbers<[1], [0], [0], [1], [0, 0, 1, 1], [], []>} : vector<8x16xbf16>, vector<16x8xbf16>, vector<8x8xf32> -> vector<8x8xf32>
    %78 = arith.addf %77, %21 : vector<8x8xf32>
    %cst_27 = arith.constant dense<0xFF800000> : vector<8xf32>
    %79 = vector.multi_reduction <maximumf>, %78, %cst_27 [1] : vector<8x8xf32> to vector<8xf32>
    %80 = vector.shape_cast %79 : vector<8xf32> to vector<8x1xf32>
    %81 = vector.broadcast %80 : vector<8x1xf32> to vector<8x8xf32>
    %82 = arith.subf %78, %81 : vector<8x8xf32>
    %83 = math.exp %82 : vector<8x8xf32>
    %cst_28 = arith.constant dense<0.000000e+00> : vector<8xf32>
    %84 = vector.multi_reduction <add>, %83, %cst_28 [1] : vector<8x8xf32> to vector<8xf32>
    %85 = vector.shape_cast %84 : vector<8xf32> to vector<8x1xf32>
    %86 = tpu.reciprocal %85 {approx = true} : vector<8x1xf32> -> vector<8x1xf32>
    %87 = vector.broadcast %86 : vector<8x1xf32> to vector<8x8xf32>
    %88 = arith.mulf %83, %87 : vector<8x8xf32>
    %89 = arith.truncf %88 : vector<8x8xf32> to vector<8x8xbf16>
    %cst_29 = arith.constant dense<0.000000e+00> : vector<8x16xf32>
    %90 = tpu.matmul %89, %75, %cst_29 {dimension_numbers = #tpu.dot_dimension_numbers<[1], [0], [0], [1], [0, 0, 1, 1], [], []>} : vector<8x8xbf16>, vector<8x16xbf16>, vector<8x16xf32> -> vector<8x16xf32>
    %91 = vector.extract_strided_slice %1 {offsets = [0, 48], sizes = [8, 16], strides = [1, 1]} : vector<8x64xf32> to vector<8x16xf32>
    %cst_30 = arith.constant 2.500000e-01 : f32
    %92 = vector.broadcast %cst_30 : f32 to vector<8x16xf32>
    %93 = arith.mulf %91, %92 : vector<8x16xf32>
    %94 = arith.truncf %93 : vector<8x16xf32> to vector<8x16xbf16>
    %95 = vector.extract_strided_slice %3 {offsets = [0, 48], sizes = [8, 16], strides = [1, 1]} : vector<8x64xf32> to vector<8x16xf32>
    %96 = arith.truncf %95 : vector<8x16xf32> to vector<8x16xbf16>
    %97 = vector.extract_strided_slice %5 {offsets = [0, 48], sizes = [8, 16], strides = [1, 1]} : vector<8x64xf32> to vector<8x16xf32>
    %98 = arith.truncf %97 : vector<8x16xf32> to vector<8x16xbf16>
    %99 = tpu.transpose %96, [1, 0] : vector<8x16xbf16> -> vector<16x8xbf16>
    %cst_31 = arith.constant dense<0.000000e+00> : vector<8x8xf32>
    %100 = tpu.matmul %94, %99, %cst_31 {dimension_numbers = #tpu.dot_dimension_numbers<[1], [0], [0], [1], [0, 0, 1, 1], [], []>} : vector<8x16xbf16>, vector<16x8xbf16>, vector<8x8xf32> -> vector<8x8xf32>
    %101 = arith.addf %100, %21 : vector<8x8xf32>
    %cst_32 = arith.constant dense<0xFF800000> : vector<8xf32>
    %102 = vector.multi_reduction <maximumf>, %101, %cst_32 [1] : vector<8x8xf32> to vector<8xf32>
    %103 = vector.shape_cast %102 : vector<8xf32> to vector<8x1xf32>
    %104 = vector.broadcast %103 : vector<8x1xf32> to vector<8x8xf32>
    %105 = arith.subf %101, %104 : vector<8x8xf32>
    %106 = math.exp %105 : vector<8x8xf32>
    %cst_33 = arith.constant dense<0.000000e+00> : vector<8xf32>
    %107 = vector.multi_reduction <add>, %106, %cst_33 [1] : vector<8x8xf32> to vector<8xf32>
    %108 = vector.shape_cast %107 : vector<8xf32> to vector<8x1xf32>
    %109 = tpu.reciprocal %108 {approx = true} : vector<8x1xf32> -> vector<8x1xf32>
    %110 = vector.broadcast %109 : vector<8x1xf32> to vector<8x8xf32>
    %111 = arith.mulf %106, %110 : vector<8x8xf32>
    %112 = arith.truncf %111 : vector<8x8xf32> to vector<8x8xbf16>
    %cst_34 = arith.constant dense<0.000000e+00> : vector<8x16xf32>
    %113 = tpu.matmul %112, %98, %cst_34 {dimension_numbers = #tpu.dot_dimension_numbers<[1], [0], [0], [1], [0, 0, 1, 1], [], []>} : vector<8x8xbf16>, vector<8x16xbf16>, vector<8x16xf32> -> vector<8x16xf32>
    %114 = tpu.concatenate %44, %67, %90, %113 in 1 : vector<8x16xf32>, vector<8x16xf32>, vector<8x16xf32>, vector<8x16xf32> -> vector<8x64xf32>
    %115 = arith.truncf %114 : vector<8x64xf32> to vector<8x64xbf16>
    %c0_35 = arith.constant 0 : index
    %c0_36 = arith.constant 0 : index
    %116 = vector.load %arg5[%c0_35, %c0_36] : memref<64x64xbf16, #tpu.memory_space<vmem>>, vector<64x64xbf16>
    %cst_37 = arith.constant dense<0.000000e+00> : vector<8x64xf32>
    %117 = tpu.matmul %115, %116, %cst_37 {dimension_numbers = #tpu.dot_dimension_numbers<[1], [0], [0], [1], [0, 0, 1, 1], [], []>} : vector<8x64xbf16>, vector<64x64xbf16>, vector<8x64xf32> -> vector<8x64xf32>
    %c0_38 = arith.constant 0 : index
    %c0_39 = arith.constant 0 : index
    %118 = vector.load %arg6[%c0_38, %c0_39] : memref<1x64xf32, #tpu.memory_space<vmem>>, vector<1x64xf32>
    %119 = vector.broadcast %118 : vector<1x64xf32> to vector<8x64xf32>
    %120 = arith.addf %117, %119 : vector<8x64xf32>
    %c0_40 = arith.constant 0 : index
    %c0_41 = arith.constant 0 : index
    %c0_42 = arith.constant 0 : index
    %121 = vector.load %arg7[%c0_40, %c0_41, %c0_42] : memref<1x8x64xf32, #tpu.memory_space<vmem>>, vector<1x8x64xf32>
    %122 = vector.shape_cast %121 : vector<1x8x64xf32> to vector<8x64xf32>
    %123 = vector.shape_cast %120 : vector<8x64xf32> to vector<1x8x64xf32>
    tpu.vector_store %arg7[%c0_40, %c0_41, %c0_42], %123 {strides = array<i32>} : memref<1x8x64xf32, #tpu.memory_space<vmem>>, vector<1x8x64xf32>,
    return
  }
  func.func @transform_0(%arg0: i32) -> (i32, i32, i32) {
    %c0_i32 = arith.constant 0 : i32
    %c0_i32_0 = arith.constant 0 : i32
    %c0_i32_1 = arith.constant 0 : i32
    return %arg0, %c0_i32, %c0_i32_0 : i32, i32, i32
  }
  func.func @transform_1(%arg0: i32) -> (i32, i32, i32) {
    %c0_i32 = arith.constant 0 : i32
    %c0_i32_0 = arith.constant 0 : i32
    %c0_i32_1 = arith.constant 0 : i32
    return %arg0, %c0_i32, %c0_i32_0 : i32, i32, i32
  }
  func.func @transform_2(%arg0: i32) -> (i32, i32, i32) {
    %c0_i32 = arith.constant 0 : i32
    %c0_i32_0 = arith.constant 0 : i32
    %c0_i32_1 = arith.constant 0 : i32
    return %arg0, %c0_i32, %c0_i32_0 : i32, i32, i32
  }
  func.func @transform_3(%arg0: i32) -> (i32, i32, i32) {
    %c0_i32 = arith.constant 0 : i32
    %c0_i32_0 = arith.constant 0 : i32
    %c0_i32_1 = arith.constant 0 : i32
    return %arg0, %c0_i32, %c0_i32_0 : i32, i32, i32
  }
  func.func @transform_4(%arg0: i32) -> (i32, i32) {
    %c0_i32 = arith.constant 0 : i32
    %c0_i32_0 = arith.constant 0 : i32
    %c0_i32_1 = arith.constant 0 : i32
    return %c0_i32, %c0_i32_0 : i32, i32
  }
  func.func @transform_5(%arg0: i32) -> (i32, i32) {
    %c0_i32 = arith.constant 0 : i32
    %c0_i32_0 = arith.constant 0 : i32
    %c0_i32_1 = arith.constant 0 : i32
    return %c0_i32, %c0_i32_0 : i32, i32
  }
  func.func @transform_6(%arg0: i32) -> (i32, i32, i32) {
    %c0_i32 = arith.constant 0 : i32
    %c0_i32_0 = arith.constant 0 : i32
    %c0_i32_1 = arith.constant 0 : i32
    return %arg0, %c0_i32, %c0_i32_0 : i32, i32, i32
  }
}

module attributes {stable_mosaic.version = 11 : i64} {
  func.func @_matmul_bias_kernel(%arg0: i32, %arg1: i32, %arg2: i32, %arg3: memref<16x64xbf16, #tpu.memory_space<vmem>>, %arg4: memref<64x64xbf16, #tpu.memory_space<vmem>>, %arg5: memref<1x64xf32, #tpu.memory_space<vmem>>, %arg6: memref<16x64xf32, #tpu.memory_space<vmem>>, %arg7: memref<16x64xf32, #tpu.memory_space<vmem>>) attributes {dimension_semantics = [#tpu.dimension_semantics<parallel>, #tpu.dimension_semantics<parallel>, #tpu.dimension_semantics<arbitrary>], iteration_bounds = array<i64: 1, 1, 1>, scalar_prefetch = 0 : i64, scratch_operands = 1 : i64, tpu.core_type = #tpu.core_type<tc>, window_params = [{transform_indices = @transform_0, window_bounds = array<i64: 16, 64>}, {transform_indices = @transform_1, window_bounds = array<i64: 64, 64>}, {transform_indices = @transform_2, window_bounds = array<i64: 1, 64>}, {transform_indices = @transform_3, window_bounds = array<i64: 16, 64>}]} {
    %c0_i32 = arith.constant 0 : i32
    %0 = arith.cmpi eq, %arg2, %c0_i32 : i32
    %1 = arith.extui %0 : i1 to i32
    %c0_i32_0 = arith.constant 0 : i32
    %2 = arith.cmpi ne, %1, %c0_i32_0 : i32
    scf.if %2 {
      %cst_10 = arith.constant 0.000000e+00 : f32
      %12 = vector.broadcast %cst_10 : f32 to vector<16x64xf32>
      %c0_11 = arith.constant 0 : index
      %c0_12 = arith.constant 0 : index
      %13 = vector.load %arg7[%c0_11, %c0_12] : memref<16x64xf32, #tpu.memory_space<vmem>>, vector<16x64xf32>
      tpu.vector_store %arg7[%c0_11, %c0_12], %12 {strides = array<i32>} : memref<16x64xf32, #tpu.memory_space<vmem>>, vector<16x64xf32>,
    } else {
    }
    %c0 = arith.constant 0 : index
    %c0_1 = arith.constant 0 : index
    %3 = vector.load %arg7[%c0, %c0_1] : memref<16x64xf32, #tpu.memory_space<vmem>>, vector<16x64xf32>
    %c0_2 = arith.constant 0 : index
    %c0_3 = arith.constant 0 : index
    %4 = vector.load %arg3[%c0_2, %c0_3] : memref<16x64xbf16, #tpu.memory_space<vmem>>, vector<16x64xbf16>
    %c0_4 = arith.constant 0 : index
    %c0_5 = arith.constant 0 : index
    %5 = vector.load %arg4[%c0_4, %c0_5] : memref<64x64xbf16, #tpu.memory_space<vmem>>, vector<64x64xbf16>
    %cst = arith.constant dense<0.000000e+00> : vector<16x64xf32>
    %6 = tpu.matmul %4, %5, %cst {dimension_numbers = #tpu.dot_dimension_numbers<[1], [0], [0], [1], [0, 0, 1, 1], [], []>} : vector<16x64xbf16>, vector<64x64xbf16>, vector<16x64xf32> -> vector<16x64xf32>
    %7 = arith.addf %3, %6 : vector<16x64xf32>
    %c0_6 = arith.constant 0 : index
    %c0_7 = arith.constant 0 : index
    %8 = vector.load %arg7[%c0_6, %c0_7] : memref<16x64xf32, #tpu.memory_space<vmem>>, vector<16x64xf32>
    tpu.vector_store %arg7[%c0_6, %c0_7], %7 {strides = array<i32>} : memref<16x64xf32, #tpu.memory_space<vmem>>, vector<16x64xf32>,
    %c0_i32_8 = arith.constant 0 : i32
    %9 = arith.cmpi eq, %arg2, %c0_i32_8 : i32
    %10 = arith.extui %9 : i1 to i32
    %c0_i32_9 = arith.constant 0 : i32
    %11 = arith.cmpi ne, %10, %c0_i32_9 : i32
    scf.if %11 {
      %c0_10 = arith.constant 0 : index
      %c0_11 = arith.constant 0 : index
      %12 = vector.load %arg7[%c0_10, %c0_11] : memref<16x64xf32, #tpu.memory_space<vmem>>, vector<16x64xf32>
      %c0_12 = arith.constant 0 : index
      %c0_13 = arith.constant 0 : index
      %13 = vector.load %arg5[%c0_12, %c0_13] : memref<1x64xf32, #tpu.memory_space<vmem>>, vector<1x64xf32>
      %14 = vector.broadcast %13 : vector<1x64xf32> to vector<16x64xf32>
      %15 = arith.addf %12, %14 : vector<16x64xf32>
      %c0_14 = arith.constant 0 : index
      %c0_15 = arith.constant 0 : index
      %16 = vector.load %arg6[%c0_14, %c0_15] : memref<16x64xf32, #tpu.memory_space<vmem>>, vector<16x64xf32>
      tpu.vector_store %arg6[%c0_14, %c0_15], %15 {strides = array<i32>} : memref<16x64xf32, #tpu.memory_space<vmem>>, vector<16x64xf32>,
    } else {
    }
    return
  }
  func.func @transform_0(%arg0: i32, %arg1: i32, %arg2: i32) -> (i32, i32) {
    %c0_i32 = arith.constant 0 : i32
    return %arg0, %arg2 : i32, i32
  }
  func.func @transform_1(%arg0: i32, %arg1: i32, %arg2: i32) -> (i32, i32) {
    %c0_i32 = arith.constant 0 : i32
    return %arg2, %arg1 : i32, i32
  }
  func.func @transform_2(%arg0: i32, %arg1: i32, %arg2: i32) -> (i32, i32) {
    %c0_i32 = arith.constant 0 : i32
    %c0_i32_0 = arith.constant 0 : i32
    return %c0_i32, %arg1 : i32, i32
  }
  func.func @transform_3(%arg0: i32, %arg1: i32, %arg2: i32) -> (i32, i32) {
    %c0_i32 = arith.constant 0 : i32
    return %arg0, %arg1 : i32, i32
  }
}

module attributes {stable_mosaic.version = 11 : i64} {
  func.func @_attention_kernel(%arg0: i32, %arg1: memref<1x8x64xf32, #tpu.memory_space<vmem>>, %arg2: memref<1x8x64xf32, #tpu.memory_space<vmem>>, %arg3: memref<1x8x64xf32, #tpu.memory_space<vmem>>, %arg4: memref<1x1x8xf32, #tpu.memory_space<vmem>>, %arg5: memref<64x64xbf16, #tpu.memory_space<vmem>>, %arg6: memref<1x64xf32, #tpu.memory_space<vmem>>, %arg7: memref<1x8x64xf32, #tpu.memory_space<vmem>>) attributes {dimension_semantics = [#tpu.dimension_semantics<parallel>], iteration_bounds = array<i64: 2>, scalar_prefetch = 0 : i64, scratch_operands = 0 : i64, tpu.core_type = #tpu.core_type<tc>, window_params = [{transform_indices = @transform_0, window_bounds = array<i64: 1, 8, 64>}, {transform_indices = @transform_1, window_bounds = array<i64: 1, 8, 64>}, {transform_indices = @transform_2, window_bounds = array<i64: 1, 8, 64>}, {transform_indices = @transform_3, window_bounds = array<i64: 1, 1, 8>}, {pipeline_mode = #tpu.pipeline_mode<synchronous>, transform_indices = @transform_4, window_bounds = array<i64: 64, 64>}, {pipeline_mode = #tpu.pipeline_mode<synchronous>, transform_indices = @transform_5, window_bounds = array<i64: 1, 64>}, {transform_indices = @transform_6, window_bounds = array<i64: 1, 8, 64>}]} {
    %c0 = arith.constant 0 : index
    %c0_0 = arith.constant 0 : index
    %c0_1 = arith.constant 0 : index
    %0 = vector.load %arg1[%c0, %c0_0, %c0_1] : memref<1x8x64xf32, #tpu.memory_space<vmem>>, vector<1x8x64xf32>
    %1 = vector.shape_cast %0 : vector<1x8x64xf32> to vector<8x64xf32>
    %c0_2 = arith.constant 0 : index
    %c0_3 = arith.constant 0 : index
    %c0_4 = arith.constant 0 : index
    %2 = vector.load %arg2[%c0_2, %c0_3, %c0_4] : memref<1x8x64xf32, #tpu.memory_space<vmem>>, vector<1x8x64xf32>
    %3 = vector.shape_cast %2 : vector<1x8x64xf32> to vector<8x64xf32>
    %c0_5 = arith.constant 0 : index
    %c0_6 = arith.constant 0 : index
    %c0_7 = arith.constant 0 : index
    %4 = vector.load %arg3[%c0_5, %c0_6, %c0_7] : memref<1x8x64xf32, #tpu.memory_space<vmem>>, vector<1x8x64xf32>
    %5 = vector.shape_cast %4 : vector<1x8x64xf32> to vector<8x64xf32>
    %c0_8 = arith.constant 0 : index
    %c0_9 = arith.constant 0 : index
    %c0_10 = arith.constant 0 : index
    %6 = vector.load %arg4[%c0_8, %c0_9, %c0_10] : memref<1x1x8xf32, #tpu.memory_space<vmem>>, vector<1x1x8xf32>
    %7 = vector.shape_cast %6 : vector<1x1x8xf32> to vector<1x8xf32>
    %cst = arith.constant 5.000000e-01 : f32
    %8 = vector.broadcast %cst : f32 to vector<1x8xf32>
    %9 = arith.cmpf ogt, %7, %8 : vector<1x8xf32>
    %cst_11 = arith.constant 0.000000e+00 : f32
    %cst_12 = arith.constant -1.000000e+09 : f32
    %10 = vector.broadcast %cst_11 : f32 to vector<1x8xf32>
    %11 = vector.broadcast %cst_12 : f32 to vector<1x8xf32>
    %12 = arith.select %9, %10, %11 : vector<1x8xi1>, vector<1x8xf32>
    %13 = vector.shape_cast %12 : vector<1x8xf32> to vector<1x8xf32>
    %14 = vector.broadcast %13 : vector<1x8xf32> to vector<8x8xf32>
    %15 = vector.extract_strided_slice %1 {offsets = [0, 0], sizes = [8, 16], strides = [1, 1]} : vector<8x64xf32> to vector<8x16xf32>
    %cst_13 = arith.constant 2.500000e-01 : f32
    %16 = vector.broadcast %cst_13 : f32 to vector<8x16xf32>
    %17 = arith.mulf %15, %16 : vector<8x16xf32>
    %18 = arith.truncf %17 : vector<8x16xf32> to vector<8x16xbf16>
    %19 = vector.extract_strided_slice %3 {offsets = [0, 0], sizes = [8, 16], strides = [1, 1]} : vector<8x64xf32> to vector<8x16xf32>
    %20 = arith.truncf %19 : vector<8x16xf32> to vector<8x16xbf16>
    %21 = vector.extract_strided_slice %5 {offsets = [0, 0], sizes = [8, 16], strides = [1, 1]} : vector<8x64xf32> to vector<8x16xf32>
    %22 = arith.truncf %21 : vector<8x16xf32> to vector<8x16xbf16>
    %23 = tpu.transpose %20, [1, 0] : vector<8x16xbf16> -> vector<16x8xbf16>
    %cst_14 = arith.constant dense<0.000000e+00> : vector<8x8xf32>
    %24 = tpu.matmul %18, %23, %cst_14 {dimension_numbers = #tpu.dot_dimension_numbers<[1], [0], [0], [1], [0, 0, 1, 1], [], []>} : vector<8x16xbf16>, vector<16x8xbf16>, vector<8x8xf32> -> vector<8x8xf32>
    %25 = arith.addf %24, %14 : vector<8x8xf32>
    %cst_15 = arith.constant dense<0xFF800000> : vector<8xf32>
    %26 = vector.multi_reduction <maximumf>, %25, %cst_15 [1] : vector<8x8xf32> to vector<8xf32>
    %27 = vector.shape_cast %26 : vector<8xf32> to vector<8x1xf32>
    %28 = vector.broadcast %27 : vector<8x1xf32> to vector<8x8xf32>
    %29 = arith.subf %25, %28 : vector<8x8xf32>
    %30 = math.exp %29 : vector<8x8xf32>
    %cst_16 = arith.constant dense<0.000000e+00> : vector<8xf32>
    %31 = vector.multi_reduction <add>, %30, %cst_16 [1] : vector<8x8xf32> to vector<8xf32>
    %32 = vector.shape_cast %31 : vector<8xf32> to vector<8x1xf32>
    %33 = tpu.reciprocal %32 {approx = true} : vector<8x1xf32> -> vector<8x1xf32>
    %34 = vector.broadcast %33 : vector<8x1xf32> to vector<8x8xf32>
    %35 = arith.mulf %30, %34 : vector<8x8xf32>
    %36 = arith.truncf %35 : vector<8x8xf32> to vector<8x8xbf16>
    %cst_17 = arith.constant dense<0.000000e+00> : vector<8x16xf32>
    %37 = tpu.matmul %36, %22, %cst_17 {dimension_numbers = #tpu.dot_dimension_numbers<[1], [0], [0], [1], [0, 0, 1, 1], [], []>} : vector<8x8xbf16>, vector<8x16xbf16>, vector<8x16xf32> -> vector<8x16xf32>
    %38 = vector.extract_strided_slice %1 {offsets = [0, 16], sizes = [8, 16], strides = [1, 1]} : vector<8x64xf32> to vector<8x16xf32>
    %cst_18 = arith.constant 2.500000e-01 : f32
    %39 = vector.broadcast %cst_18 : f32 to vector<8x16xf32>
    %40 = arith.mulf %38, %39 : vector<8x16xf32>
    %41 = arith.truncf %40 : vector<8x16xf32> to vector<8x16xbf16>
    %42 = vector.extract_strided_slice %3 {offsets = [0, 16], sizes = [8, 16], strides = [1, 1]} : vector<8x64xf32> to vector<8x16xf32>
    %43 = arith.truncf %42 : vector<8x16xf32> to vector<8x16xbf16>
    %44 = vector.extract_strided_slice %5 {offsets = [0, 16], sizes = [8, 16], strides = [1, 1]} : vector<8x64xf32> to vector<8x16xf32>
    %45 = arith.truncf %44 : vector<8x16xf32> to vector<8x16xbf16>
    %46 = tpu.transpose %43, [1, 0] : vector<8x16xbf16> -> vector<16x8xbf16>
    %cst_19 = arith.constant dense<0.000000e+00> : vector<8x8xf32>
    %47 = tpu.matmul %41, %46, %cst_19 {dimension_numbers = #tpu.dot_dimension_numbers<[1], [0], [0], [1], [0, 0, 1, 1], [], []>} : vector<8x16xbf16>, vector<16x8xbf16>, vector<8x8xf32> -> vector<8x8xf32>
    %48 = arith.addf %47, %14 : vector<8x8xf32>
    %cst_20 = arith.constant dense<0xFF800000> : vector<8xf32>
    %49 = vector.multi_reduction <maximumf>, %48, %cst_20 [1] : vector<8x8xf32> to vector<8xf32>
    %50 = vector.shape_cast %49 : vector<8xf32> to vector<8x1xf32>
    %51 = vector.broadcast %50 : vector<8x1xf32> to vector<8x8xf32>
    %52 = arith.subf %48, %51 : vector<8x8xf32>
    %53 = math.exp %52 : vector<8x8xf32>
    %cst_21 = arith.constant dense<0.000000e+00> : vector<8xf32>
    %54 = vector.multi_reduction <add>, %53, %cst_21 [1] : vector<8x8xf32> to vector<8xf32>
    %55 = vector.shape_cast %54 : vector<8xf32> to vector<8x1xf32>
    %56 = tpu.reciprocal %55 {approx = true} : vector<8x1xf32> -> vector<8x1xf32>
    %57 = vector.broadcast %56 : vector<8x1xf32> to vector<8x8xf32>
    %58 = arith.mulf %53, %57 : vector<8x8xf32>
    %59 = arith.truncf %58 : vector<8x8xf32> to vector<8x8xbf16>
    %cst_22 = arith.constant dense<0.000000e+00> : vector<8x16xf32>
    %60 = tpu.matmul %59, %45, %cst_22 {dimension_numbers = #tpu.dot_dimension_numbers<[1], [0], [0], [1], [0, 0, 1, 1], [], []>} : vector<8x8xbf16>, vector<8x16xbf16>, vector<8x16xf32> -> vector<8x16xf32>
    %61 = vector.extract_strided_slice %1 {offsets = [0, 32], sizes = [8, 16], strides = [1, 1]} : vector<8x64xf32> to vector<8x16xf32>
    %cst_23 = arith.constant 2.500000e-01 : f32
    %62 = vector.broadcast %cst_23 : f32 to vector<8x16xf32>
    %63 = arith.mulf %61, %62 : vector<8x16xf32>
    %64 = arith.truncf %63 : vector<8x16xf32> to vector<8x16xbf16>
    %65 = vector.extract_strided_slice %3 {offsets = [0, 32], sizes = [8, 16], strides = [1, 1]} : vector<8x64xf32> to vector<8x16xf32>
    %66 = arith.truncf %65 : vector<8x16xf32> to vector<8x16xbf16>
    %67 = vector.extract_strided_slice %5 {offsets = [0, 32], sizes = [8, 16], strides = [1, 1]} : vector<8x64xf32> to vector<8x16xf32>
    %68 = arith.truncf %67 : vector<8x16xf32> to vector<8x16xbf16>
    %69 = tpu.transpose %66, [1, 0] : vector<8x16xbf16> -> vector<16x8xbf16>
    %cst_24 = arith.constant dense<0.000000e+00> : vector<8x8xf32>
    %70 = tpu.matmul %64, %69, %cst_24 {dimension_numbers = #tpu.dot_dimension_numbers<[1], [0], [0], [1], [0, 0, 1, 1], [], []>} : vector<8x16xbf16>, vector<16x8xbf16>, vector<8x8xf32> -> vector<8x8xf32>
    %71 = arith.addf %70, %14 : vector<8x8xf32>
    %cst_25 = arith.constant dense<0xFF800000> : vector<8xf32>
    %72 = vector.multi_reduction <maximumf>, %71, %cst_25 [1] : vector<8x8xf32> to vector<8xf32>
    %73 = vector.shape_cast %72 : vector<8xf32> to vector<8x1xf32>
    %74 = vector.broadcast %73 : vector<8x1xf32> to vector<8x8xf32>
    %75 = arith.subf %71, %74 : vector<8x8xf32>
    %76 = math.exp %75 : vector<8x8xf32>
    %cst_26 = arith.constant dense<0.000000e+00> : vector<8xf32>
    %77 = vector.multi_reduction <add>, %76, %cst_26 [1] : vector<8x8xf32> to vector<8xf32>
    %78 = vector.shape_cast %77 : vector<8xf32> to vector<8x1xf32>
    %79 = tpu.reciprocal %78 {approx = true} : vector<8x1xf32> -> vector<8x1xf32>
    %80 = vector.broadcast %79 : vector<8x1xf32> to vector<8x8xf32>
    %81 = arith.mulf %76, %80 : vector<8x8xf32>
    %82 = arith.truncf %81 : vector<8x8xf32> to vector<8x8xbf16>
    %cst_27 = arith.constant dense<0.000000e+00> : vector<8x16xf32>
    %83 = tpu.matmul %82, %68, %cst_27 {dimension_numbers = #tpu.dot_dimension_numbers<[1], [0], [0], [1], [0, 0, 1, 1], [], []>} : vector<8x8xbf16>, vector<8x16xbf16>, vector<8x16xf32> -> vector<8x16xf32>
    %84 = vector.extract_strided_slice %1 {offsets = [0, 48], sizes = [8, 16], strides = [1, 1]} : vector<8x64xf32> to vector<8x16xf32>
    %cst_28 = arith.constant 2.500000e-01 : f32
    %85 = vector.broadcast %cst_28 : f32 to vector<8x16xf32>
    %86 = arith.mulf %84, %85 : vector<8x16xf32>
    %87 = arith.truncf %86 : vector<8x16xf32> to vector<8x16xbf16>
    %88 = vector.extract_strided_slice %3 {offsets = [0, 48], sizes = [8, 16], strides = [1, 1]} : vector<8x64xf32> to vector<8x16xf32>
    %89 = arith.truncf %88 : vector<8x16xf32> to vector<8x16xbf16>
    %90 = vector.extract_strided_slice %5 {offsets = [0, 48], sizes = [8, 16], strides = [1, 1]} : vector<8x64xf32> to vector<8x16xf32>
    %91 = arith.truncf %90 : vector<8x16xf32> to vector<8x16xbf16>
    %92 = tpu.transpose %89, [1, 0] : vector<8x16xbf16> -> vector<16x8xbf16>
    %cst_29 = arith.constant dense<0.000000e+00> : vector<8x8xf32>
    %93 = tpu.matmul %87, %92, %cst_29 {dimension_numbers = #tpu.dot_dimension_numbers<[1], [0], [0], [1], [0, 0, 1, 1], [], []>} : vector<8x16xbf16>, vector<16x8xbf16>, vector<8x8xf32> -> vector<8x8xf32>
    %94 = arith.addf %93, %14 : vector<8x8xf32>
    %cst_30 = arith.constant dense<0xFF800000> : vector<8xf32>
    %95 = vector.multi_reduction <maximumf>, %94, %cst_30 [1] : vector<8x8xf32> to vector<8xf32>
    %96 = vector.shape_cast %95 : vector<8xf32> to vector<8x1xf32>
    %97 = vector.broadcast %96 : vector<8x1xf32> to vector<8x8xf32>
    %98 = arith.subf %94, %97 : vector<8x8xf32>
    %99 = math.exp %98 : vector<8x8xf32>
    %cst_31 = arith.constant dense<0.000000e+00> : vector<8xf32>
    %100 = vector.multi_reduction <add>, %99, %cst_31 [1] : vector<8x8xf32> to vector<8xf32>
    %101 = vector.shape_cast %100 : vector<8xf32> to vector<8x1xf32>
    %102 = tpu.reciprocal %101 {approx = true} : vector<8x1xf32> -> vector<8x1xf32>
    %103 = vector.broadcast %102 : vector<8x1xf32> to vector<8x8xf32>
    %104 = arith.mulf %99, %103 : vector<8x8xf32>
    %105 = arith.truncf %104 : vector<8x8xf32> to vector<8x8xbf16>
    %cst_32 = arith.constant dense<0.000000e+00> : vector<8x16xf32>
    %106 = tpu.matmul %105, %91, %cst_32 {dimension_numbers = #tpu.dot_dimension_numbers<[1], [0], [0], [1], [0, 0, 1, 1], [], []>} : vector<8x8xbf16>, vector<8x16xbf16>, vector<8x16xf32> -> vector<8x16xf32>
    %107 = tpu.concatenate %37, %60, %83, %106 in 1 : vector<8x16xf32>, vector<8x16xf32>, vector<8x16xf32>, vector<8x16xf32> -> vector<8x64xf32>
    %108 = arith.truncf %107 : vector<8x64xf32> to vector<8x64xbf16>
    %c0_33 = arith.constant 0 : index
    %c0_34 = arith.constant 0 : index
    %109 = vector.load %arg5[%c0_33, %c0_34] : memref<64x64xbf16, #tpu.memory_space<vmem>>, vector<64x64xbf16>
    %cst_35 = arith.constant dense<0.000000e+00> : vector<8x64xf32>
    %110 = tpu.matmul %108, %109, %cst_35 {dimension_numbers = #tpu.dot_dimension_numbers<[1], [0], [0], [1], [0, 0, 1, 1], [], []>} : vector<8x64xbf16>, vector<64x64xbf16>, vector<8x64xf32> -> vector<8x64xf32>
    %c0_36 = arith.constant 0 : index
    %c0_37 = arith.constant 0 : index
    %111 = vector.load %arg6[%c0_36, %c0_37] : memref<1x64xf32, #tpu.memory_space<vmem>>, vector<1x64xf32>
    %112 = vector.broadcast %111 : vector<1x64xf32> to vector<8x64xf32>
    %113 = arith.addf %110, %112 : vector<8x64xf32>
    %c0_38 = arith.constant 0 : index
    %c0_39 = arith.constant 0 : index
    %c0_40 = arith.constant 0 : index
    %114 = vector.load %arg7[%c0_38, %c0_39, %c0_40] : memref<1x8x64xf32, #tpu.memory_space<vmem>>, vector<1x8x64xf32>
    %115 = vector.shape_cast %114 : vector<1x8x64xf32> to vector<8x64xf32>
    %116 = vector.shape_cast %113 : vector<8x64xf32> to vector<1x8x64xf32>
    tpu.vector_store %arg7[%c0_38, %c0_39, %c0_40], %116 {strides = array<i32>} : memref<1x8x64xf32, #tpu.memory_space<vmem>>, vector<1x8x64xf32>,
    return
  }
  func.func @transform_0(%arg0: i32) -> (i32, i32, i32) {
    %c0_i32 = arith.constant 0 : i32
    %c0_i32_0 = arith.constant 0 : i32
    %c0_i32_1 = arith.constant 0 : i32
    return %arg0, %c0_i32, %c0_i32_0 : i32, i32, i32
  }
  func.func @transform_1(%arg0: i32) -> (i32, i32, i32) {
    %c0_i32 = arith.constant 0 : i32
    %c0_i32_0 = arith.constant 0 : i32
    %c0_i32_1 = arith.constant 0 : i32
    return %arg0, %c0_i32, %c0_i32_0 : i32, i32, i32
  }
  func.func @transform_2(%arg0: i32) -> (i32, i32, i32) {
    %c0_i32 = arith.constant 0 : i32
    %c0_i32_0 = arith.constant 0 : i32
    %c0_i32_1 = arith.constant 0 : i32
    return %arg0, %c0_i32, %c0_i32_0 : i32, i32, i32
  }
  func.func @transform_3(%arg0: i32) -> (i32, i32, i32) {
    %c0_i32 = arith.constant 0 : i32
    %c0_i32_0 = arith.constant 0 : i32
    %c0_i32_1 = arith.constant 0 : i32
    return %arg0, %c0_i32, %c0_i32_0 : i32, i32, i32
  }
  func.func @transform_4(%arg0: i32) -> (i32, i32) {
    %c0_i32 = arith.constant 0 : i32
    %c0_i32_0 = arith.constant 0 : i32
    %c0_i32_1 = arith.constant 0 : i32
    return %c0_i32, %c0_i32_0 : i32, i32
  }
  func.func @transform_5(%arg0: i32) -> (i32, i32) {
    %c0_i32 = arith.constant 0 : i32
    %c0_i32_0 = arith.constant 0 : i32
    %c0_i32_1 = arith.constant 0 : i32
    return %c0_i32, %c0_i32_0 : i32, i32
  }
  func.func @transform_6(%arg0: i32) -> (i32, i32, i32) {
    %c0_i32 = arith.constant 0 : i32
    %c0_i32_0 = arith.constant 0 : i32
    %c0_i32_1 = arith.constant 0 : i32
    return %arg0, %c0_i32, %c0_i32_0 : i32, i32, i32
  }
}

module attributes {stable_mosaic.version = 11 : i64} {
  func.func @_matmul_bias_kernel(%arg0: i32, %arg1: i32, %arg2: i32, %arg3: memref<16x64xbf16, #tpu.memory_space<vmem>>, %arg4: memref<64x128xbf16, #tpu.memory_space<vmem>>, %arg5: memref<1x128xf32, #tpu.memory_space<vmem>>, %arg6: memref<16x128xf32, #tpu.memory_space<vmem>>, %arg7: memref<16x128xf32, #tpu.memory_space<vmem>>) attributes {dimension_semantics = [#tpu.dimension_semantics<parallel>, #tpu.dimension_semantics<parallel>, #tpu.dimension_semantics<arbitrary>], iteration_bounds = array<i64: 1, 1, 1>, scalar_prefetch = 0 : i64, scratch_operands = 1 : i64, tpu.core_type = #tpu.core_type<tc>, window_params = [{transform_indices = @transform_0, window_bounds = array<i64: 16, 64>}, {transform_indices = @transform_1, window_bounds = array<i64: 64, 128>}, {transform_indices = @transform_2, window_bounds = array<i64: 1, 128>}, {transform_indices = @transform_3, window_bounds = array<i64: 16, 128>}]} {
    %c0_i32 = arith.constant 0 : i32
    %0 = arith.cmpi eq, %arg2, %c0_i32 : i32
    %1 = arith.extui %0 : i1 to i32
    %c0_i32_0 = arith.constant 0 : i32
    %2 = arith.cmpi ne, %1, %c0_i32_0 : i32
    scf.if %2 {
      %cst_10 = arith.constant 0.000000e+00 : f32
      %12 = vector.broadcast %cst_10 : f32 to vector<16x128xf32>
      %c0_11 = arith.constant 0 : index
      %c0_12 = arith.constant 0 : index
      %13 = vector.load %arg7[%c0_11, %c0_12] : memref<16x128xf32, #tpu.memory_space<vmem>>, vector<16x128xf32>
      tpu.vector_store %arg7[%c0_11, %c0_12], %12 {strides = array<i32>} : memref<16x128xf32, #tpu.memory_space<vmem>>, vector<16x128xf32>,
    } else {
    }
    %c0 = arith.constant 0 : index
    %c0_1 = arith.constant 0 : index
    %3 = vector.load %arg7[%c0, %c0_1] : memref<16x128xf32, #tpu.memory_space<vmem>>, vector<16x128xf32>
    %c0_2 = arith.constant 0 : index
    %c0_3 = arith.constant 0 : index
    %4 = vector.load %arg3[%c0_2, %c0_3] : memref<16x64xbf16, #tpu.memory_space<vmem>>, vector<16x64xbf16>
    %c0_4 = arith.constant 0 : index
    %c0_5 = arith.constant 0 : index
    %5 = vector.load %arg4[%c0_4, %c0_5] : memref<64x128xbf16, #tpu.memory_space<vmem>>, vector<64x128xbf16>
    %cst = arith.constant dense<0.000000e+00> : vector<16x128xf32>
    %6 = tpu.matmul %4, %5, %cst {dimension_numbers = #tpu.dot_dimension_numbers<[1], [0], [0], [1], [0, 0, 1, 1], [], []>} : vector<16x64xbf16>, vector<64x128xbf16>, vector<16x128xf32> -> vector<16x128xf32>
    %7 = arith.addf %3, %6 : vector<16x128xf32>
    %c0_6 = arith.constant 0 : index
    %c0_7 = arith.constant 0 : index
    %8 = vector.load %arg7[%c0_6, %c0_7] : memref<16x128xf32, #tpu.memory_space<vmem>>, vector<16x128xf32>
    tpu.vector_store %arg7[%c0_6, %c0_7], %7 {strides = array<i32>} : memref<16x128xf32, #tpu.memory_space<vmem>>, vector<16x128xf32>,
    %c0_i32_8 = arith.constant 0 : i32
    %9 = arith.cmpi eq, %arg2, %c0_i32_8 : i32
    %10 = arith.extui %9 : i1 to i32
    %c0_i32_9 = arith.constant 0 : i32
    %11 = arith.cmpi ne, %10, %c0_i32_9 : i32
    scf.if %11 {
      %c0_10 = arith.constant 0 : index
      %c0_11 = arith.constant 0 : index
      %12 = vector.load %arg7[%c0_10, %c0_11] : memref<16x128xf32, #tpu.memory_space<vmem>>, vector<16x128xf32>
      %c0_12 = arith.constant 0 : index
      %c0_13 = arith.constant 0 : index
      %13 = vector.load %arg5[%c0_12, %c0_13] : memref<1x128xf32, #tpu.memory_space<vmem>>, vector<1x128xf32>
      %14 = vector.broadcast %13 : vector<1x128xf32> to vector<16x128xf32>
      %15 = arith.addf %12, %14 : vector<16x128xf32>
      %cst_14 = arith.constant 5.000000e-01 : f32
      %16 = vector.broadcast %cst_14 : f32 to vector<16x128xf32>
      %17 = arith.mulf %16, %15 : vector<16x128xf32>
      %cst_15 = arith.constant 4.471500e-02 : f32
      %18 = vector.broadcast %cst_15 : f32 to vector<16x128xf32>
      %19 = arith.mulf %18, %15 : vector<16x128xf32>
      %20 = arith.mulf %19, %15 : vector<16x128xf32>
      %21 = arith.mulf %20, %15 : vector<16x128xf32>
      %22 = arith.addf %15, %21 : vector<16x128xf32>
      %cst_16 = arith.constant 0.797884583 : f32
      %23 = vector.broadcast %cst_16 : f32 to vector<16x128xf32>
      %24 = arith.mulf %23, %22 : vector<16x128xf32>
      %25 = math.tanh %24 : vector<16x128xf32>
      %cst_17 = arith.constant 1.000000e+00 : f32
      %26 = vector.broadcast %cst_17 : f32 to vector<16x128xf32>
      %27 = arith.addf %26, %25 : vector<16x128xf32>
      %28 = arith.mulf %17, %27 : vector<16x128xf32>
      %c0_18 = arith.constant 0 : index
      %c0_19 = arith.constant 0 : index
      %29 = vector.load %arg6[%c0_18, %c0_19] : memref<16x128xf32, #tpu.memory_space<vmem>>, vector<16x128xf32>
      tpu.vector_store %arg6[%c0_18, %c0_19], %28 {strides = array<i32>} : memref<16x128xf32, #tpu.memory_space<vmem>>, vector<16x128xf32>,
    } else {
    }
    return
  }
  func.func @transform_0(%arg0: i32, %arg1: i32, %arg2: i32) -> (i32, i32) {
    %c0_i32 = arith.constant 0 : i32
    return %arg0, %arg2 : i32, i32
  }
  func.func @transform_1(%arg0: i32, %arg1: i32, %arg2: i32) -> (i32, i32) {
    %c0_i32 = arith.constant 0 : i32
    return %arg2, %arg1 : i32, i32
  }
  func.func @transform_2(%arg0: i32, %arg1: i32, %arg2: i32) -> (i32, i32) {
    %c0_i32 = arith.constant 0 : i32
    %c0_i32_0 = arith.constant 0 : i32
    return %c0_i32, %arg1 : i32, i32
  }
  func.func @transform_3(%arg0: i32, %arg1: i32, %arg2: i32) -> (i32, i32) {
    %c0_i32 = arith.constant 0 : i32
    return %arg0, %arg1 : i32, i32
  }
}

module attributes {stable_mosaic.version = 11 : i64} {
  func.func @_matmul_bias_kernel(%arg0: i32, %arg1: i32, %arg2: i32, %arg3: memref<16x128xbf16, #tpu.memory_space<vmem>>, %arg4: memref<128x64xbf16, #tpu.memory_space<vmem>>, %arg5: memref<1x64xf32, #tpu.memory_space<vmem>>, %arg6: memref<16x64xf32, #tpu.memory_space<vmem>>, %arg7: memref<16x64xf32, #tpu.memory_space<vmem>>) attributes {dimension_semantics = [#tpu.dimension_semantics<parallel>, #tpu.dimension_semantics<parallel>, #tpu.dimension_semantics<arbitrary>], iteration_bounds = array<i64: 1, 1, 1>, scalar_prefetch = 0 : i64, scratch_operands = 1 : i64, tpu.core_type = #tpu.core_type<tc>, window_params = [{transform_indices = @transform_0, window_bounds = array<i64: 16, 128>}, {transform_indices = @transform_1, window_bounds = array<i64: 128, 64>}, {transform_indices = @transform_2, window_bounds = array<i64: 1, 64>}, {transform_indices = @transform_3, window_bounds = array<i64: 16, 64>}]} {
    %c0_i32 = arith.constant 0 : i32
    %0 = arith.cmpi eq, %arg2, %c0_i32 : i32
    %1 = arith.extui %0 : i1 to i32
    %c0_i32_0 = arith.constant 0 : i32
    %2 = arith.cmpi ne, %1, %c0_i32_0 : i32
    scf.if %2 {
      %cst_10 = arith.constant 0.000000e+00 : f32
      %12 = vector.broadcast %cst_10 : f32 to vector<16x64xf32>
      %c0_11 = arith.constant 0 : index
      %c0_12 = arith.constant 0 : index
      %13 = vector.load %arg7[%c0_11, %c0_12] : memref<16x64xf32, #tpu.memory_space<vmem>>, vector<16x64xf32>
      tpu.vector_store %arg7[%c0_11, %c0_12], %12 {strides = array<i32>} : memref<16x64xf32, #tpu.memory_space<vmem>>, vector<16x64xf32>,
    } else {
    }
    %c0 = arith.constant 0 : index
    %c0_1 = arith.constant 0 : index
    %3 = vector.load %arg7[%c0, %c0_1] : memref<16x64xf32, #tpu.memory_space<vmem>>, vector<16x64xf32>
    %c0_2 = arith.constant 0 : index
    %c0_3 = arith.constant 0 : index
    %4 = vector.load %arg3[%c0_2, %c0_3] : memref<16x128xbf16, #tpu.memory_space<vmem>>, vector<16x128xbf16>
    %c0_4 = arith.constant 0 : index
    %c0_5 = arith.constant 0 : index
    %5 = vector.load %arg4[%c0_4, %c0_5] : memref<128x64xbf16, #tpu.memory_space<vmem>>, vector<128x64xbf16>
    %cst = arith.constant dense<0.000000e+00> : vector<16x64xf32>
    %6 = tpu.matmul %4, %5, %cst {dimension_numbers = #tpu.dot_dimension_numbers<[1], [0], [0], [1], [0, 0, 1, 1], [], []>} : vector<16x128xbf16>, vector<128x64xbf16>, vector<16x64xf32> -> vector<16x64xf32>
    %7 = arith.addf %3, %6 : vector<16x64xf32>
    %c0_6 = arith.constant 0 : index
    %c0_7 = arith.constant 0 : index
    %8 = vector.load %arg7[%c0_6, %c0_7] : memref<16x64xf32, #tpu.memory_space<vmem>>, vector<16x64xf32>
    tpu.vector_store %arg7[%c0_6, %c0_7], %7 {strides = array<i32>} : memref<16x64xf32, #tpu.memory_space<vmem>>, vector<16x64xf32>,
    %c0_i32_8 = arith.constant 0 : i32
    %9 = arith.cmpi eq, %arg2, %c0_i32_8 : i32
    %10 = arith.extui %9 : i1 to i32
    %c0_i32_9 = arith.constant 0 : i32
    %11 = arith.cmpi ne, %10, %c0_i32_9 : i32
    scf.if %11 {
      %c0_10 = arith.constant 0 : index
      %c0_11 = arith.constant 0 : index
      %12 = vector.load %arg7[%c0_10, %c0_11] : memref<16x64xf32, #tpu.memory_space<vmem>>, vector<16x64xf32>
      %c0_12 = arith.constant 0 : index
      %c0_13 = arith.constant 0 : index
      %13 = vector.load %arg5[%c0_12, %c0_13] : memref<1x64xf32, #tpu.memory_space<vmem>>, vector<1x64xf32>
      %14 = vector.broadcast %13 : vector<1x64xf32> to vector<16x64xf32>
      %15 = arith.addf %12, %14 : vector<16x64xf32>
      %c0_14 = arith.constant 0 : index
      %c0_15 = arith.constant 0 : index
      %16 = vector.load %arg6[%c0_14, %c0_15] : memref<16x64xf32, #tpu.memory_space<vmem>>, vector<16x64xf32>
      tpu.vector_store %arg6[%c0_14, %c0_15], %15 {strides = array<i32>} : memref<16x64xf32, #tpu.memory_space<vmem>>, vector<16x64xf32>,
    } else {
    }
    return
  }
  func.func @transform_0(%arg0: i32, %arg1: i32, %arg2: i32) -> (i32, i32) {
    %c0_i32 = arith.constant 0 : i32
    return %arg0, %arg2 : i32, i32
  }
  func.func @transform_1(%arg0: i32, %arg1: i32, %arg2: i32) -> (i32, i32) {
    %c0_i32 = arith.constant 0 : i32
    return %arg2, %arg1 : i32, i32
  }
  func.func @transform_2(%arg0: i32, %arg1: i32, %arg2: i32) -> (i32, i32) {
    %c0_i32 = arith.constant 0 : i32
    %c0_i32_0 = arith.constant 0 : i32
    return %c0_i32, %arg1 : i32, i32
  }
  func.func @transform_3(%arg0: i32, %arg1: i32, %arg2: i32) -> (i32, i32) {
    %c0_i32 = arith.constant 0 : i32
    return %arg0, %arg1 : i32, i32
  }
}

module attributes {stable_mosaic.version = 11 : i64} {
  func.func @_matmul_bias_kernel(%arg0: i32, %arg1: i32, %arg2: i32, %arg3: memref<16x64xbf16, #tpu.memory_space<vmem>>, %arg4: memref<64x128xbf16, #tpu.memory_space<vmem>>, %arg5: memref<1x128xf32, #tpu.memory_space<vmem>>, %arg6: memref<16x128xf32, #tpu.memory_space<vmem>>, %arg7: memref<16x128xf32, #tpu.memory_space<vmem>>) attributes {dimension_semantics = [#tpu.dimension_semantics<parallel>, #tpu.dimension_semantics<parallel>, #tpu.dimension_semantics<arbitrary>], iteration_bounds = array<i64: 1, 1, 1>, scalar_prefetch = 0 : i64, scratch_operands = 1 : i64, tpu.core_type = #tpu.core_type<tc>, window_params = [{transform_indices = @transform_0, window_bounds = array<i64: 16, 64>}, {transform_indices = @transform_1, window_bounds = array<i64: 64, 128>}, {transform_indices = @transform_2, window_bounds = array<i64: 1, 128>}, {transform_indices = @transform_3, window_bounds = array<i64: 16, 128>}]} {
    %c0_i32 = arith.constant 0 : i32
    %0 = arith.cmpi eq, %arg2, %c0_i32 : i32
    %1 = arith.extui %0 : i1 to i32
    %c0_i32_0 = arith.constant 0 : i32
    %2 = arith.cmpi ne, %1, %c0_i32_0 : i32
    scf.if %2 {
      %cst_10 = arith.constant 0.000000e+00 : f32
      %12 = vector.broadcast %cst_10 : f32 to vector<16x128xf32>
      %c0_11 = arith.constant 0 : index
      %c0_12 = arith.constant 0 : index
      %13 = vector.load %arg7[%c0_11, %c0_12] : memref<16x128xf32, #tpu.memory_space<vmem>>, vector<16x128xf32>
      tpu.vector_store %arg7[%c0_11, %c0_12], %12 {strides = array<i32>} : memref<16x128xf32, #tpu.memory_space<vmem>>, vector<16x128xf32>,
    } else {
    }
    %c0 = arith.constant 0 : index
    %c0_1 = arith.constant 0 : index
    %3 = vector.load %arg7[%c0, %c0_1] : memref<16x128xf32, #tpu.memory_space<vmem>>, vector<16x128xf32>
    %c0_2 = arith.constant 0 : index
    %c0_3 = arith.constant 0 : index
    %4 = vector.load %arg3[%c0_2, %c0_3] : memref<16x64xbf16, #tpu.memory_space<vmem>>, vector<16x64xbf16>
    %c0_4 = arith.constant 0 : index
    %c0_5 = arith.constant 0 : index
    %5 = vector.load %arg4[%c0_4, %c0_5] : memref<64x128xbf16, #tpu.memory_space<vmem>>, vector<64x128xbf16>
    %cst = arith.constant dense<0.000000e+00> : vector<16x128xf32>
    %6 = tpu.matmul %4, %5, %cst {dimension_numbers = #tpu.dot_dimension_numbers<[1], [0], [0], [1], [0, 0, 1, 1], [], []>} : vector<16x64xbf16>, vector<64x128xbf16>, vector<16x128xf32> -> vector<16x128xf32>
    %7 = arith.addf %3, %6 : vector<16x128xf32>
    %c0_6 = arith.constant 0 : index
    %c0_7 = arith.constant 0 : index
    %8 = vector.load %arg7[%c0_6, %c0_7] : memref<16x128xf32, #tpu.memory_space<vmem>>, vector<16x128xf32>
    tpu.vector_store %arg7[%c0_6, %c0_7], %7 {strides = array<i32>} : memref<16x128xf32, #tpu.memory_space<vmem>>, vector<16x128xf32>,
    %c0_i32_8 = arith.constant 0 : i32
    %9 = arith.cmpi eq, %arg2, %c0_i32_8 : i32
    %10 = arith.extui %9 : i1 to i32
    %c0_i32_9 = arith.constant 0 : i32
    %11 = arith.cmpi ne, %10, %c0_i32_9 : i32
    scf.if %11 {
      %c0_10 = arith.constant 0 : index
      %c0_11 = arith.constant 0 : index
      %12 = vector.load %arg7[%c0_10, %c0_11] : memref<16x128xf32, #tpu.memory_space<vmem>>, vector<16x128xf32>
      %c0_12 = arith.constant 0 : index
      %c0_13 = arith.constant 0 : index
      %13 = vector.load %arg5[%c0_12, %c0_13] : memref<1x128xf32, #tpu.memory_space<vmem>>, vector<1x128xf32>
      %14 = vector.broadcast %13 : vector<1x128xf32> to vector<16x128xf32>
      %15 = arith.addf %12, %14 : vector<16x128xf32>
      %c0_14 = arith.constant 0 : index
      %c0_15 = arith.constant 0 : index
      %16 = vector.load %arg6[%c0_14, %c0_15] : memref<16x128xf32, #tpu.memory_space<vmem>>, vector<16x128xf32>
      tpu.vector_store %arg6[%c0_14, %c0_15], %15 {strides = array<i32>} : memref<16x128xf32, #tpu.memory_space<vmem>>, vector<16x128xf32>,
    } else {
    }
    return
  }
  func.func @transform_0(%arg0: i32, %arg1: i32, %arg2: i32) -> (i32, i32) {
    %c0_i32 = arith.constant 0 : i32
    return %arg0, %arg2 : i32, i32
  }
  func.func @transform_1(%arg0: i32, %arg1: i32, %arg2: i32) -> (i32, i32) {
    %c0_i32 = arith.constant 0 : i32
    return %arg2, %arg1 : i32, i32
  }
  func.func @transform_2(%arg0: i32, %arg1: i32, %arg2: i32) -> (i32, i32) {
    %c0_i32 = arith.constant 0 : i32
    %c0_i32_0 = arith.constant 0 : i32
    return %c0_i32, %arg1 : i32, i32
  }
  func.func @transform_3(%arg0: i32, %arg1: i32, %arg2: i32) -> (i32, i32) {
    %c0_i32 = arith.constant 0 : i32
    return %arg0, %arg1 : i32, i32
  }
}

module attributes {stable_mosaic.version = 11 : i64} {
  func.func @_matmul_bias_kernel(%arg0: i32, %arg1: i32, %arg2: i32, %arg3: memref<16x64xbf16, #tpu.memory_space<vmem>>, %arg4: memref<64x128xbf16, #tpu.memory_space<vmem>>, %arg5: memref<1x128xf32, #tpu.memory_space<vmem>>, %arg6: memref<16x128xf32, #tpu.memory_space<vmem>>, %arg7: memref<16x128xf32, #tpu.memory_space<vmem>>) attributes {dimension_semantics = [#tpu.dimension_semantics<parallel>, #tpu.dimension_semantics<parallel>, #tpu.dimension_semantics<arbitrary>], iteration_bounds = array<i64: 1, 1, 1>, scalar_prefetch = 0 : i64, scratch_operands = 1 : i64, tpu.core_type = #tpu.core_type<tc>, window_params = [{transform_indices = @transform_0, window_bounds = array<i64: 16, 64>}, {transform_indices = @transform_1, window_bounds = array<i64: 64, 128>}, {transform_indices = @transform_2, window_bounds = array<i64: 1, 128>}, {transform_indices = @transform_3, window_bounds = array<i64: 16, 128>}]} {
    %c0_i32 = arith.constant 0 : i32
    %0 = arith.cmpi eq, %arg2, %c0_i32 : i32
    %1 = arith.extui %0 : i1 to i32
    %c0_i32_0 = arith.constant 0 : i32
    %2 = arith.cmpi ne, %1, %c0_i32_0 : i32
    scf.if %2 {
      %cst_10 = arith.constant 0.000000e+00 : f32
      %12 = vector.broadcast %cst_10 : f32 to vector<16x128xf32>
      %c0_11 = arith.constant 0 : index
      %c0_12 = arith.constant 0 : index
      %13 = vector.load %arg7[%c0_11, %c0_12] : memref<16x128xf32, #tpu.memory_space<vmem>>, vector<16x128xf32>
      tpu.vector_store %arg7[%c0_11, %c0_12], %12 {strides = array<i32>} : memref<16x128xf32, #tpu.memory_space<vmem>>, vector<16x128xf32>,
    } else {
    }
    %c0 = arith.constant 0 : index
    %c0_1 = arith.constant 0 : index
    %3 = vector.load %arg7[%c0, %c0_1] : memref<16x128xf32, #tpu.memory_space<vmem>>, vector<16x128xf32>
    %c0_2 = arith.constant 0 : index
    %c0_3 = arith.constant 0 : index
    %4 = vector.load %arg3[%c0_2, %c0_3] : memref<16x64xbf16, #tpu.memory_space<vmem>>, vector<16x64xbf16>
    %c0_4 = arith.constant 0 : index
    %c0_5 = arith.constant 0 : index
    %5 = vector.load %arg4[%c0_4, %c0_5] : memref<64x128xbf16, #tpu.memory_space<vmem>>, vector<64x128xbf16>
    %cst = arith.constant dense<0.000000e+00> : vector<16x128xf32>
    %6 = tpu.matmul %4, %5, %cst {dimension_numbers = #tpu.dot_dimension_numbers<[1], [0], [0], [1], [0, 0, 1, 1], [], []>} : vector<16x64xbf16>, vector<64x128xbf16>, vector<16x128xf32> -> vector<16x128xf32>
    %7 = arith.addf %3, %6 : vector<16x128xf32>
    %c0_6 = arith.constant 0 : index
    %c0_7 = arith.constant 0 : index
    %8 = vector.load %arg7[%c0_6, %c0_7] : memref<16x128xf32, #tpu.memory_space<vmem>>, vector<16x128xf32>
    tpu.vector_store %arg7[%c0_6, %c0_7], %7 {strides = array<i32>} : memref<16x128xf32, #tpu.memory_space<vmem>>, vector<16x128xf32>,
    %c0_i32_8 = arith.constant 0 : i32
    %9 = arith.cmpi eq, %arg2, %c0_i32_8 : i32
    %10 = arith.extui %9 : i1 to i32
    %c0_i32_9 = arith.constant 0 : i32
    %11 = arith.cmpi ne, %10, %c0_i32_9 : i32
    scf.if %11 {
      %c0_10 = arith.constant 0 : index
      %c0_11 = arith.constant 0 : index
      %12 = vector.load %arg7[%c0_10, %c0_11] : memref<16x128xf32, #tpu.memory_space<vmem>>, vector<16x128xf32>
      %c0_12 = arith.constant 0 : index
      %c0_13 = arith.constant 0 : index
      %13 = vector.load %arg5[%c0_12, %c0_13] : memref<1x128xf32, #tpu.memory_space<vmem>>, vector<1x128xf32>
      %14 = vector.broadcast %13 : vector<1x128xf32> to vector<16x128xf32>
      %15 = arith.addf %12, %14 : vector<16x128xf32>
      %c0_14 = arith.constant 0 : index
      %c0_15 = arith.constant 0 : index
      %16 = vector.load %arg6[%c0_14, %c0_15] : memref<16x128xf32, #tpu.memory_space<vmem>>, vector<16x128xf32>
      tpu.vector_store %arg6[%c0_14, %c0_15], %15 {strides = array<i32>} : memref<16x128xf32, #tpu.memory_space<vmem>>, vector<16x128xf32>,
    } else {
    }
    return
  }
  func.func @transform_0(%arg0: i32, %arg1: i32, %arg2: i32) -> (i32, i32) {
    %c0_i32 = arith.constant 0 : i32
    return %arg0, %arg2 : i32, i32
  }
  func.func @transform_1(%arg0: i32, %arg1: i32, %arg2: i32) -> (i32, i32) {
    %c0_i32 = arith.constant 0 : i32
    return %arg2, %arg1 : i32, i32
  }
  func.func @transform_2(%arg0: i32, %arg1: i32, %arg2: i32) -> (i32, i32) {
    %c0_i32 = arith.constant 0 : i32
    %c0_i32_0 = arith.constant 0 : i32
    return %c0_i32, %arg1 : i32, i32
  }
  func.func @transform_3(%arg0: i32, %arg1: i32, %arg2: i32) -> (i32, i32) {
    %c0_i32 = arith.constant 0 : i32
    return %arg0, %arg1 : i32, i32
  }
}

</mosaic_0001>

<bundles_post_ra>
// kernel: forward.48
= control target key start
LH: loop header
LB: loop body
LE: loop exit
PB: predicated region body
PF: predicated region fallthrough
CT: control target
= control target key end

     0   :  { %vm23_vm0 = vcmask 523264   ;;  %s136_s0 = inlined_call_operand.vmem [shape: f32[16,64], index: 0, kind: input, shape index: {}]   ;;  %s137_s1 = inlined_call_operand.vmem [shape: f32[16,64], index: 1, kind: input, shape index: {}]   ;;  %s138_s2 = inlined_call_operand.vmem [shape: f32[1,64], index: 2, kind: input, shape index: {}]   ;;  %s139_s3 = inlined_call_operand.vmem [shape: f32[1,64], index: 3, kind: input, shape index: {}]   ;;  %s140_s4 = inlined_call_operand.vmem [shape: f32[16,64], index: 4, kind: output, shape index: {}]  }
   0x1   :  { %v17_v0 = vld [vmem:[%s136_s0] sm:$0xff]  ;;  %v18_v2 = vld [vmem:[%s136_s0 + $0x8] sm:$0xff] }
   0x2   :  { %v19_v1 = vld [vmem:[%s137_s1] sm:$0xff]  ;;  %v20_v4 = vld [vmem:[%s137_s1 + $0x8] sm:$0xff] }
   0x3   :  { %v21_v3 = vadd.f32 %v19_v1, %v17_v0  ;;  %v22_v5 = vadd.f32 %v20_v4, %v18_v2  ;;  %v75_v25 = vld [vmem:[%s138_s2] ss:$0 sm:$0xff] }
   0x4   :  { %v76_v27 = vld [vmem:[%s139_s3] ss:$0 sm:$0xff] }
   0x5   :  { %v24_v6 = vsel %vm23_vm0, %v21_v3, 0.0  ;;  %v27_v7 = vsel %vm23_vm0, %v22_v5, 0.0 }
   0x6   :  { %25 = vadd.xlane.f32.xlu0 %v24_v6 }
   0xa   :  { %28 = vadd.xlane.f32.xlu0 %v27_v7 }
  0x8f   :  { %v26_v8 = vpop.xlane.xlu0 %25 }
  0x90   :  { %v31_v9 = vmul.f32 0.015625, %v26_v8 }
  0x92   :  { %v33_v10 = vsub.f32 %v21_v3, %v31_v9 }
  0x93   :  { %v29_v11 = vpop.xlane.xlu0 %28 }
  0x94   :  { %v32_v12 = vmul.f32 0.015625, %v29_v11  ;;  %v35_v13 = vmul.f32 %v33_v10, %v33_v10 }
  0x96   :  { %v34_v14 = vsub.f32 %v22_v5, %v32_v12  ;;  %v37_v15 = vsel %vm23_vm0, %v35_v13, 0.0 }
  0x97   :  { %38 = vadd.xlane.f32.xlu1 %v37_v15 }
  0x98   :  { %v36_v16 = vmul.f32 %v34_v14, %v34_v14 }
  0x9a   :  { %v40_v17 = vsel %vm23_vm0, %v36_v16, 0.0 }
  0x9b   :  { %41 = vadd.xlane.f32.xlu1 %v40_v17 }
 0x120   :  { %v39_v18 = vpop.xlane.xlu1 %38 }
 0x121   :  { %v43_v19 = vmul.f32 0.015625, %v39_v18 }
 0x123   :  { %v45_v20 = vadd.f32 1e-05, %v43_v19 }
 0x124   :  { %v42_v21 = vpop.xlane.xlu1 %41 }
 0x125   :  { %77 = vrsqrt.f32 %v45_v20  ;;  %v44_v22 = vmul.f32 0.015625, %v42_v21 }
 0x127   :  { %v46_v23 = vadd.f32 1e-05, %v44_v22 }
 0x129   :  { %79 = vrsqrt.f32 %v46_v23 }
 0x132   :  { %v78_v24 = vpop.eup %77 }
 0x133   :  { %v49_v26 = vmul.f32 %v78_v24, %v33_v10 }
 0x135   :  { %v58_v28 = vmul.f32 %v75_v25, %v49_v26 }
 0x136   :  { %v80_v29 = vpop.eup %79 }
 0x137   :  { %v67_v30 = vadd.f32 %v76_v27, %v58_v28  ;;  %v50_v31 = vmul.f32 %v80_v29, %v34_v14 }
 0x139   :  { %69 = vst.msk [vmem:[%s140_s4] sm:$0xff] %vm23_vm0, %v67_v30  ;;  %v59_v32 = vmul.f32 %v75_v25, %v50_v31 }
 0x13b   :  { %v68_v33 = vadd.f32 %v76_v27, %v59_v32 }
 0x13d   :  { %70 = vst.msk [vmem:[%s140_s4 + $0x8] sm:$0xff] %vm23_vm0, %v68_v33 }

// kernel: forward.49
= control target key start
LH: loop header
LB: loop body
LE: loop exit
PB: predicated region body
PF: predicated region fallthrough
CT: control target
= control target key end

     0   :  { %vm20_vm0 = vcmask 523264   ;;  %v194_v1 = vmov 0   ;;  %v195_v2 = vmov 0.0   ;;  %v147_v11 = vlaneseq  ;;  %s265_s1 = inlined_call_operand.vmem [shape: bf16[64,192], index: 1, kind: input, shape index: {}]   ;;  %s266_s0 = inlined_call_operand.vmem [shape: bf16[16,64], index: 0, kind: input, shape index: {}]   ;;  %s267_s2 = inlined_call_operand.vmem [shape: f32[1,192], index: 2, kind: input, shape index: {}]   ;;  %s268_s3 = inlined_call_operand.vmem [shape: f32[16,192], index: 3, kind: output, shape index: {}]  }
   0x1   :  { %v181_v0 = vld [vmem:[%s265_s1 + $0x34] ss:$8 sps:$4 sm:$0xff]   ;;  %119 = vmatprep.mubr.bf16.mxu0 %v194_v1  ;;  %21 = vst.msk [vmem:[#allocation2 + $0x8] sm:$0xff] %vm20_vm0, %v195_v2  ;;  %23 = vst.msk [vmem:[#allocation2 + $0x18] sm:$0xff] %vm20_vm0, %v195_v2  ;;  %v183_v3 = vld [vmem:[%s265_s1 + $0x30] ss:$8 sps:$4 sm:$0xff]  }
   0x2   :  { %95 = vmatprep.subr.bf16.mxu0 %v181_v0  ;;  %v184_v4 = vld [vmem:[%s265_s1 + $0x24] ss:$8 sps:$4 sm:$0xff]   ;;  %v186_v5 = vld [vmem:[%s265_s1 + $0x20] ss:$8 sps:$4 sm:$0xff]   ;;  %v187_v6 = vld [vmem:[%s265_s1 + $0x14] ss:$8 sps:$4 sm:$0xff]  }
   0x3   :  { %96 = vmatpush1.bf16.msra.mxu0 %v183_v3  ;;  %v189_v7 = vld [vmem:[%s265_s1 + $0x10] ss:$8 sps:$4 sm:$0xff]   ;;  %v190_v8 = vld [vmem:[%s265_s1 + $0x4] ss:$8 sps:$4 sm:$0xff]   ;;  %v192_v9 = vld [vmem:[%s265_s1] ss:$8 sps:$4 sm:$0xff]  }
   0x4   :  { %97 = vmatprep.subr.bf16.mxu0 %v184_v4  ;;  %v193_v10 = vld [vmem:[%s266_s0] sm:$0xff]   ;;  %v148_v12 = vshrl.u32 %v147_v11, 7 }
   0x5   :  { %v145_v14 = vld [vmem:[%s267_s2] sm:$0x3] }
   0x6   :  { %v149_v13 = vsub.s32 0, %v148_v12  ;;  %v153_v23 = vsub.s32 1, %v148_v12 }
   0x7   :  { %98 = vmatpush1.bf16.msra.mxu0 %v186_v5 }
   0x8   :  { %99 = vmatprep.subr.bf16.mxu0 %v187_v6  ;;  %v150_v15 = vrot.slane %v145_v14, %v149_v13  ;;  %v25_v17 = vld [vmem:[#allocation2 + $0x8] sm:$0xff]  ;;  %v27_v22 = vld [vmem:[#allocation2 + $0x18] sm:$0xff]  ;;  %v154_v27 = vrot.slane %v145_v14, %v153_v23 }
   0xb   :  { %100 = vmatpush1.bf16.msra.mxu0 %v189_v7 }
   0xc   :  { %101 = vmatprep.subr.bf16.mxu0 %v190_v8 }
   0xf   :  { %102 = vmatpush1.bf16.msra.mxu0 %v192_v9 }
  0x12   :  { %178 = vmatmul.mubr.msk.bf16.vlgmr.msra.gmra.mxu0 %vm20_vm0, %v193_v10 }
  0xd2   :  { %v121_v16 = vpop.f32.mrf.mxu0 }
  0xd3   :  { %v157_v19 = vadd.f32 %v150_v15, %v121_v16 }
  0xd4   :  { %v123_v18 = vpop.f32.mrf.mxu0 }
  0xd5   :  { %v131_v20 = vadd.f32 %v123_v18, %v25_v17  ;;  %161 = vst [vmem:[%s268_s3] sm:$0xff] %v157_v19 }
  0xd6   :  { %v125_v21 = vpop.f32.mrf.mxu0 }
  0xd7   :  { %135 = vst.msk [vmem:[#allocation2 + $0x8] sm:$0xff] %vm20_vm0, %v131_v20  ;;  %v159_v25 = vadd.f32 %v150_v15, %v125_v21 }
  0xd8   :  { %v127_v24 = vpop.f32.mrf.mxu0 }
  0xd9   :  { %v133_v26 = vadd.f32 %v127_v24, %v27_v22  ;;  %163 = vst [vmem:[%s268_s3 + $0x10] sm:$0xff] %v159_v25 }
  0xdb   :  { %137 = vst.msk [vmem:[#allocation2 + $0x18] sm:$0xff] %vm20_vm0, %v133_v26 }
  0xde   :  { %v142_v28 = vld [vmem:[#allocation2 + $0x8] sm:$0xff] }
  0xdf   :  { %v158_v29 = vadd.f32 %v154_v27, %v142_v28 }
  0xe1   :  { %162 = vst.msk [vmem:[%s268_s3 + $0x8] sm:$0xff] %vm20_vm0, %v158_v29 }
  0xe2   :  { %v144_v30 = vld [vmem:[#allocation2 + $0x18] sm:$0xff] }
  0xe3   :  { %v160_v31 = vadd.f32 %v154_v27, %v144_v30 }
  0xe5   :  { %164 = vst.msk [vmem:[%s268_s3 + $0x18] sm:$0xff] %vm20_vm0, %v160_v31 }

// kernel: forward.52
= control target key start
LH: loop header
LB: loop body
LE: loop exit
PB: predicated region body
PF: predicated region fallthrough
CT: control target
= control target key end

     0   :  { %vm19_vm0 = vcmask 523264   ;;  %v163_v0 = vmov 0.0   ;;  %vm164_vm1 = vmmov 0   ;;  %s216_s1 = inlined_call_operand.vmem [shape: bf16[64,64], index: 1, kind: input, shape index: {}]   ;;  %s217_s0 = inlined_call_operand.vmem [shape: bf16[16,64], index: 0, kind: input, shape index: {}]   ;;  %s218_s2 = inlined_call_operand.vmem [shape: f32[1,64], index: 2, kind: input, shape index: {}]   ;;  %s219_s3 = inlined_call_operand.vmem [shape: f32[16,64], index: 3, kind: output, shape index: {}]  }
   0x1   :  { %144 = vmatprep.subr.bf16.mxu0 %v163_v0  ;;  %v158_v1 = vld [vmem:[%s216_s1 + $0x18] sm:$0xff]   ;;  %152 = vmatprep.mubr.msk.bf16.mxu0 %vm164_vm1, %v163_v0  ;;  %20 = vst.msk [vmem:[#allocation2] sm:$0xff] %vm19_vm0, %v163_v0  ;;  %21 = vst.msk [vmem:[#allocation2 + $0x8] sm:$0xff] %vm19_vm0, %v163_v0  ;;  %v159_v2 = vld [vmem:[%s216_s1 + $0x10] sm:$0xff]  }
   0x2   :  { %145 = vmatpush3.bf16.msra.mxu0 %v158_v1  ;;  %v160_v3 = vld [vmem:[%s216_s1 + $0x8] sm:$0xff]   ;;  %v161_v4 = vld [vmem:[%s216_s1] sm:$0xff]  }
   0x3   :  { %146 = vmatprep.subr.bf16.mxu0 %v163_v0  ;;  %v162_v5 = vld [vmem:[%s217_s0] sm:$0xff]  }
   0x4   :  { %v138_v14 = vld [vmem:[%s218_s2] ss:$0 sm:$0xff] }
   0x6   :  { %147 = vmatpush3.bf16.msra.mxu0 %v159_v2 }
   0x7   :  { %148 = vmatprep.subr.bf16.mxu0 %v163_v0 }
   0x8   :  { %v22_v6 = vld [vmem:[#allocation2] sm:$0xff]  ;;  %v23_v10 = vld [vmem:[#allocation2 + $0x8] sm:$0xff] }
   0xa   :  { %149 = vmatpush3.bf16.msra.mxu0 %v160_v3 }
   0xb   :  { %150 = vmatprep.subr.bf16.mxu0 %v163_v0 }
   0xe   :  { %151 = vmatpush3.bf16.msra.mxu0 %v161_v4 }
  0x11   :  { %153 = vmatmul.mubr.msk.bf16.vlgmr.msra.gmra.mxu0 %vm19_vm0, %v162_v5 }
  0xd1   :  { %v101_v7 = vpop.f32.mrf.mxu0 }
  0xd2   :  { %v108_v8 = vadd.f32 %v101_v7, %v22_v6 }
  0xd3   :  { %v154_v9 = vpop.f32.mrf.mxu0 }
  0xd4   :  { %110 = vst.msk [vmem:[#allocation2] sm:$0xff] %vm19_vm0, %v108_v8 }
  0xd5   :  { %v104_v11 = vpop.f32.mrf.mxu0 }
  0xd6   :  { %v109_v12 = vadd.f32 %v104_v11, %v23_v10 }
  0xd7   :  { %v155_v13 = vpop.f32.mrf.mxu0 }
  0xd8   :  { %111 = vst.msk [vmem:[#allocation2 + $0x8] sm:$0xff] %vm19_vm0, %v109_v12 }
  0xdb   :  { %v115_v15 = vld [vmem:[#allocation2] sm:$0xff] }
  0xdc   :  { %v124_v16 = vadd.f32 %v138_v14, %v115_v15 }
  0xde   :  { %126 = vst.msk [vmem:[%s219_s3] sm:$0xff] %vm19_vm0, %v124_v16 }
  0xdf   :  { %v116_v17 = vld [vmem:[#allocation2 + $0x8] sm:$0xff] }
  0xe0   :  { %v125_v18 = vadd.f32 %v138_v14, %v116_v17 }
  0xe2   :  { %127 = vst.msk [vmem:[%s219_s3 + $0x8] sm:$0xff] %vm19_vm0, %v125_v18 }

// kernel: forward.50
= control target key start
LH: loop header
LB: loop body
LE: loop exit
PB: predicated region body
PF: predicated region fallthrough
CT: control target
= control target key end

     0   :  { %s1142_s21 = smov 0   ;;  %s1257_s0 = inlined_call_operand.vmem [shape: f32[2,8,64], index: 0, kind: input, shape index: {}]   ;;  %s1258_s1 = inlined_call_operand.vmem [shape: f32[2,8,64], index: 1, kind: input, shape index: {}]   ;;  %s1259_s2 = inlined_call_operand.vmem [shape: f32[2,8,64], index: 2, kind: input, shape index: {}]   ;;  %s1260_s3 = inlined_call_operand.vmem [shape: f32[2,1,8], index: 3, kind: input, shape index: {}]   ;;  %s1261_s4 = inlined_call_operand.vmem [shape: bf16[64,64], index: 4, kind: input, shape index: {}]   ;;  %s1262_s5 = inlined_call_operand.vmem [shape: f32[1,64], index: 5, kind: input, shape index: {}]   ;;  %s1263_s6 = inlined_call_operand.vmem [shape: f32[2,8,64], index: 6, kind: output, shape index: {}]  }
   0x1 LB: > { %s947_s22 = sadd.s32 4294967295, %s1096_s21   ;;  %p951_p0 = scmp.ge.s32.totalorder %s1096_s21, 1  ;;  %s1096_s21 = sphi %s1142_s21, %s16_s21  }
   0x2   : > { %p237_p1 = scmp.lt.s32.totalorder %s1096_s21, 3 }
   0x4   : > { %p238_p2 = pnand %p951_p0, %p237_p1 }
   0x5   : > { %p276_p3 = scmp.lt.s32.totalorder (!%p238_p2), %s947_s22, 1  ;;  %s1100_s30 = smov (!%p238_p2), 112  }
   0x6   : > { %241 = sbr.rel (%p238_p2) target bundleno = 1175 (0x497), region = 44  ;;  %s1101_s7 = smov (!%p238_p2), 96  }
   0x7   : > { %s1102_s8 = smov (!%p238_p2), 80   ;;  %s1106_s27 = smov (!%p238_p2), 48  }
   0xb   : > { %v1098_v0 = vmov 0.0   ;;  %vm1099_vm0 = vmmov 0   ;;  %s1265_s22 = smov (!%p276_p3, %s947_s22), 1  ;;  %vm319_vm1 = vcmask 130048   ;;  %v303_v16 = vlaneseq }
   0xc   : > { %993 = vmatprep.subr.bf16.mxu0 %v1098_v0  ;;  %995 = vmatprep.mubr.msk.bf16.mxu0 %vm1099_vm0, %v1098_v0  ;;  %s1159_s23 = sshll.u32 %s1265_s22, 3  ;;  %s290_s11 = scalar_lea.vmem %s1260_s3, %s1265_s22  ;;  %v1103_v21 = vmov -1e+09   ;;  %vm366_vm4 = vcmask 64512   ;;  %vm382_vm5 = vcmask 1043456   ;;  %vm772_vm6 = vcmask 261120  }
   0xd   : > { %1005 = vmatprep.subr.bf16.mxu1 %v1098_v0  ;;  %1007 = vmatprep.mubr.msk.bf16.mxu1 %vm1099_vm0, %v1098_v0  ;;  %s283_s26 = scalar_lea.vmem %s1258_s1, %s1159_s23  ;;  %s279_s29 = scalar_lea.vmem %s1257_s0, %s1159_s23  ;;  %v299_v17 = vld [vmem:[%s290_s11] sm:$0x1]  ;;  %v304_v18 = vshrl.u32 %v303_v16, 7  ;;  %v311_v19 = vand.u32 127, %v303_v16  ;;  %vm774_vm7 = vcmask 392192   ;;  %vm816_vm8 = vcmask 523264  }
   0xe   : > { %v297_v1 = vld [vmem:[%s283_s26] sm:$0xff]  ;;  %vm300_vm2 = vcmp.gt.f32.partialorder %v299_v17, 0.5  ;;  %s287_s14 = scalar_lea.vmem %s1259_s2, %s1159_s23  ;;  %s1104_s22 = smov 16  }
   0xf   : > { %v296_v2 = vld [vmem:[%s279_s29] sm:$0xff]  ;;  %v317_v3 = vpack.c.bf16 %v297_v1, %v297_v1  ;;  %v305_v20 = vsub.s32 0, %v304_v18  ;;  %v301_v22 = vsel %vm300_vm2, 0.0, %v1103_v21  ;;  %vm312_vm3 = vcmp.ge.s32.totalorder %v304_v18, %v311_v19  ;;  %s1105_s26 = smov 32  }
  0x10   : > { %v315_v4 = vmul.f32 0.25, %v296_v2  ;;  %v313_v24 = vsel %vm312_vm3, 0.0, %v1103_v21  ;;  %v298_v55 = vld [vmem:[%s287_s14] sm:$0xff] }
  0x11   : > { %430 = vrot.lane.b32.xlu0 %v317_v3, %s1100_s30  ;;  %v324_v5 = vsel %vm319_vm1, %v317_v3, 0  ;;  %541 = vrot.lane.b32.xlu1 %v317_v3, %s1101_s7  ;;  %v306_v23 = vrot.slane %v301_v22, %v305_v20  ;;  %v318_v56 = vpack.c.bf16 %v298_v55, %v298_v55 }
  0x12   : > { %v316_v6 = vpack.c.bf16 %v315_v4, %v315_v4  ;;  %994 = vmatpush3.bf16.xpose.msra.mxu0 %v324_v5 }
  0x13   : > { %999 = vmatprep.subr.bf16.mxu0 %v1098_v0  ;;  %v314_v25 = vadd.f32 %v313_v24, %v306_v23  ;;  %v384_v57 = vsel %vm382_vm5, %v318_v56, 0 }
  0x15   : > { %427 = vrot.lane.b32.xlu0 %v316_v6, %s1100_s30  ;;  %539 = vrot.lane.b32.xlu1 %v316_v6, %s1101_s7 }
  0x19   : > { %996 = vmatmul.mubr.msk.bf16.vlgmr.msra.gmra.mxu0 %vm319_vm1, %v316_v6  ;;  %651 = vrot.lane.b32.xlu0 %v317_v3, %s1102_s8 }
  0x1a   : > { %649 = vrot.lane.b32.xlu1 %v316_v6, %s1102_s8  ;;  %1001 = vmatprep.mubr.msk.bf16.mxu0 %vm1099_vm0, %v1098_v0 }
  0x1b   : > { %1000 = vmatpush3.bf16.msra.mxu0 %v384_v57 }
  0x1c   : > { %1011 = vmatprep.subr.bf16.mxu0 %v1098_v0 }
  0x83   : > { %v431_v7 = vpop.permute.xlu0 %430  ;;  %v542_v9 = vpop.permute.xlu1 %541 }
  0x84   : > { %v436_v8 = vsel %vm319_vm1, %v431_v7, 0  ;;  %v547_v11 = vsel %vm319_vm1, %v542_v9, 0 }
  0x85   : > { %1006 = vmatpush3.bf16.xpose.msra.mxu1 %v436_v8 }
  0x86   : > { %1017 = vmatprep.subr.bf16.mxu1 %v1098_v0 }
  0x87   : > { %v428_v10 = vpop.permute.xlu0 %427  ;;  %v540_v13 = vpop.permute.xlu1 %539 }
  0x8b   : > { %v652_v12 = vpop.permute.xlu0 %651 }
  0x8c   : > { %1008 = vmatmul.mubr.msk.bf16.vlgmr.msra.gmra.mxu1 %vm319_vm1, %v428_v10  ;;  %v657_v14 = vsel %vm319_vm1, %v652_v12, 0  ;;  %v650_v15 = vpop.permute.xlu1 %649 }
  0x8d   : > { %1018 = vmatpush3.bf16.xpose.msra.mxu1 %v547_v11  ;;  %1019 = vmatprep.mubr.msk.bf16.mxu1 %vm1099_vm0, %v1098_v0 }
  0x8e   : > { %1029 = vmatprep.subr.bf16.mxu1 %v1098_v0 }
  0x94   : > { %1020 = vmatmul.mubr.msk.bf16.vlgmr.msra.gmra.mxu1 %vm319_vm1, %v540_v13 }
  0x95   : > { %1030 = vmatpush3.bf16.xpose.msra.mxu1 %v657_v14  ;;  %1031 = vmatprep.mubr.msk.bf16.mxu1 %vm1099_vm0, %v1098_v0 }
  0x96   : > { %1041 = vmatprep.subr.bf16.mxu1 %v1098_v0 }
  0x9c   : > { %1032 = vmatmul.mubr.msk.bf16.vlgmr.msra.gmra.mxu1 %vm319_vm1, %v650_v15 }
  0x9d   : > { %1049 = vmatprep.mubr.msk.bf16.mxu1 %vm1099_vm0, %v1098_v0 }
  0xd9   : > { %v360_v26 = vpop.f32.mrf.mxu0 }
  0xda   : > { %v361_v27 = vadd.f32 %v360_v26, %v314_v25 }
  0xdb   : > { %v997_v28 = vpop.f32.mrf.mxu0 }
  0xdc   : > { %v367_v29 = vsel %vm366_vm4, %v361_v27, -inf }
  0xdd   : > { %368 = vmax.xlane.f32.xlu0 %v367_v29  ;;  %v363_v30 = vpop.f32.mrf.mxu0 }
  0xdf   : > { %v998_v31 = vpop.f32.mrf.mxu0 }
 0x14c   : > { %v472_v32 = vpop.f32.mrf.mxu1 }
 0x14d   : > { %v473_v33 = vadd.f32 %v472_v32, %v314_v25 }
 0x14e   : > { %v1009_v34 = vpop.f32.mrf.mxu1 }
 0x14f   : > { %v478_v35 = vsel %vm366_vm4, %v473_v33, -inf }
 0x150   : > { %479 = vmax.xlane.f32.xlu1 %v478_v35  ;;  %v475_v36 = vpop.f32.mrf.mxu1 }
 0x151   : > { %v1070_v36 = vld [vmem:[%s1261_s4 + $0x18] sm:$0xff]  }
 0x152   : > { %v1010_v37 = vpop.f32.mrf.mxu1  ;;  %1042 = vmatpush3.bf16.msra.mxu1 %v1070_v36 }
 0x153   : > { %1043 = vmatprep.subr.bf16.mxu1 %v1098_v0  ;;  %v1071_v37 = vld [vmem:[%s1261_s4 + $0x10] sm:$0xff]  }
 0x154   : > { %v583_v38 = vpop.f32.mrf.mxu1 }
 0x155   : > { %v584_v39 = vadd.f32 %v583_v38, %v314_v25  ;;  %v1072_v38 = vld [vmem:[%s1261_s4 + $0x8] sm:$0xff]  }
 0x156   : > { %v1021_v40 = vpop.f32.mrf.mxu1  ;;  %1044 = vmatpush3.bf16.msra.mxu1 %v1071_v37 }
 0x157   : > { %v589_v41 = vsel %vm366_vm4, %v584_v39, -inf  ;;  %1045 = vmatprep.subr.bf16.mxu1 %v1098_v0 }
 0x158   : > { %v586_v42 = vpop.f32.mrf.mxu1  ;;  %590 = vmax.xlane.f32.xlu0 %v589_v41  ;;  %v1073_v41 = vld [vmem:[%s1261_s4] sm:$0xff]  }
 0x15a   : > { %v1022_v43 = vpop.f32.mrf.mxu1  ;;  %1046 = vmatpush3.bf16.msra.mxu1 %v1072_v38 }
 0x15b   : > { %1047 = vmatprep.subr.bf16.mxu1 %v1098_v0 }
 0x15c   : > { %v693_v44 = vpop.f32.mrf.mxu1 }
 0x15d   : > { %v694_v45 = vadd.f32 %v693_v44, %v314_v25 }
 0x15e   : > { %v1033_v46 = vpop.f32.mrf.mxu1  ;;  %1048 = vmatpush3.bf16.msra.mxu1 %v1073_v41 }
 0x15f   : > { %v699_v47 = vsel %vm366_vm4, %v694_v45, -inf }
 0x160   : > { %v696_v48 = vpop.f32.mrf.mxu1  ;;  %700 = vmax.xlane.f32.xlu0 %v699_v47 }
 0x162   : > { %v1034_v49 = vpop.f32.mrf.mxu1 }
 0x166   : > { %v369_v50 = vpop.xlane.xlu0 %368 }
 0x167   : > { %v370_v51 = vsub.f32 %v361_v27, %v369_v50 }
 0x169   : > { %v371_v52 = vmul.f32 1.442695, %v370_v51 }
 0x16b   : > { %1074 = vpow2.f32 %v371_v52 }
 0x178   : > { %v1075_v53 = vpop.eup %1074 }
 0x179   : > { %v373_v54 = vsel %vm366_vm4, %v1075_v53, 0.0 }
 0x17a   : > { %374 = vadd.xlane.f32.xlu1 %v373_v54 }
 0x18b   : > { %491 = vrot.lane.b32.xlu1 %v318_v56, %s1100_s30 }
 0x1d9   : > { %v480_v58 = vpop.xlane.xlu1 %479 }
 0x1da   : > { %v481_v59 = vsub.f32 %v473_v33, %v480_v58  ;;  %v964_v58 = vld [vmem:[%s1262_s5] ss:$0 sm:$0xff] }
 0x1dc   : > { %v482_v60 = vmul.f32 1.442695, %v481_v59 }
 0x1de   : > { %1076 = vpow2.f32 %v482_v60 }
 0x1e1   : > { %v591_v61 = vpop.xlane.xlu0 %590 }
 0x1e2   : > { %v592_v62 = vsub.f32 %v584_v39, %v591_v61 }
 0x1e4   : > { %v593_v63 = vmul.f32 1.442695, %v592_v62 }
 0x1e6   : > { %1078 = vpow2.f32 %v593_v63 }
 0x1e9   : > { %v701_v1 = vpop.xlane.xlu0 %700 }
 0x1ea   : > { %v702_v2 = vsub.f32 %v694_v45, %v701_v1 }
 0x1eb   : > { %v1077_v3 = vpop.eup %1076 }
 0x1ec   : > { %v703_v4 = vmul.f32 1.442695, %v702_v2  ;;  %v484_v5 = vsel %vm366_vm4, %v1077_v3, 0.0 }
 0x1ed   : > { %485 = vadd.xlane.f32.xlu0 %v484_v5 }
 0x1ee   : > { %1080 = vpow2.f32 %v703_v4 }
 0x1f3   : > { %v1079_v6 = vpop.eup %1078 }
 0x1f4   : > { %v595_v7 = vsel %vm366_vm4, %v1079_v6, 0.0 }
 0x1f5   : > { %596 = vadd.xlane.f32.xlu1 %v595_v7 }
 0x1fb   : > { %v1081_v8 = vpop.eup %1080 }
 0x1fc   : > { %v705_v9 = vsel %vm366_vm4, %v1081_v8, 0.0 }
 0x1fd   : > { %706 = vadd.xlane.f32.xlu0 %v705_v9 }
 0x203   : > { %v375_v10 = vpop.xlane.xlu1 %374 }
 0x204   : > { %1082 = vrcp.f32 %v375_v10 }
 0x206   : > { %711 = vrot.lane.b32.xlu1 %v318_v56, %s1102_s8  ;;  %s294_s8 = scalar_lea.vmem %s1263_s6, %s1159_s23 }
 0x207   : > { %v492_v12 = vpop.permute.xlu1 %491 }
 0x208   : > { %v497_v15 = vsel %vm382_vm5, %v492_v12, 0 }
 0x211   : > { %v1083_v11 = vpop.eup %1082 }
 0x212   : > { %v377_v13 = vmul.f32 %v1083_v11, %v1075_v53 }
 0x213   : > { %601 = vrot.lane.b32.xlu0 %v318_v56, %s1101_s7 }
 0x214   : > { %v378_v14 = vpack.c.bf16 %v377_v13, %v377_v13 }
 0x216   : > { %1002 = vmatmul.mubr.msk.bf16.vlgmr.msra.gmra.mxu0 %vm366_vm4, %v378_v14 }
 0x217   : > { %1012 = vmatpush3.bf16.msra.mxu0 %v497_v15  ;;  %1013 = vmatprep.mubr.msk.bf16.mxu0 %vm1099_vm0, %v1098_v0 }
 0x218   : > { %1023 = vmatprep.subr.bf16.mxu0 %v1098_v0 }
 0x276   : > { %v486_v16 = vpop.xlane.xlu0 %485 }
 0x277   : > { %1084 = vrcp.f32 %v486_v16 }
 0x27e   : > { %v597_v17 = vpop.xlane.xlu1 %596 }
 0x27f   : > { %1086 = vrcp.f32 %v597_v17 }
 0x282   : > { %v712_v25 = vpop.permute.xlu1 %711 }
 0x283   : > { %v717_v28 = vsel %vm382_vm5, %v712_v25, 0 }
 0x284   : > { %v1085_v18 = vpop.eup %1084 }
 0x285   : > { %v488_v19 = vmul.f32 %v1085_v18, %v1077_v3 }
 0x286   : > { %v707_v20 = vpop.xlane.xlu0 %706 }
 0x287   : > { %1088 = vrcp.f32 %v707_v20  ;;  %v489_v21 = vpack.c.bf16 %v488_v19, %v488_v19 }
 0x289   : > { %1014 = vmatmul.mubr.msk.bf16.vlgmr.msra.gmra.mxu0 %vm366_vm4, %v489_v21 }
 0x28a   : > { %v602_v22 = vpop.permute.xlu0 %601  ;;  %1025 = vmatprep.mubr.msk.bf16.mxu0 %vm1099_vm0, %v1098_v0 }
 0x28b   : > { %v607_v23 = vsel %vm382_vm5, %v602_v22, 0 }
 0x28c   : > { %v1087_v24 = vpop.eup %1086  ;;  %1024 = vmatpush3.bf16.msra.mxu0 %v607_v23 }
 0x28d   : > { %v599_v26 = vmul.f32 %v1087_v24, %v1079_v6  ;;  %1035 = vmatprep.subr.bf16.mxu0 %v1098_v0 }
 0x28f   : > { %v600_v27 = vpack.c.bf16 %v599_v26, %v599_v26 }
 0x291   : > { %1026 = vmatmul.mubr.msk.bf16.vlgmr.msra.gmra.mxu0 %vm366_vm4, %v600_v27 }
 0x292   : > { %1036 = vmatpush3.bf16.msra.mxu0 %v717_v28  ;;  %1037 = vmatprep.mubr.msk.bf16.mxu0 %vm1099_vm0, %v1098_v0 }
 0x294   : > { %v1089_v29 = vpop.eup %1088 }
 0x295   : > { %v709_v30 = vmul.f32 %v1089_v29, %v1081_v8 }
 0x297   : > { %v710_v31 = vpack.c.bf16 %v709_v30, %v709_v30 }
 0x299   : > { %1038 = vmatmul.mubr.msk.bf16.vlgmr.msra.gmra.mxu0 %vm366_vm4, %v710_v31 }
 0x2d6   : > { %v420_v32 = vpop.f32.mrf.mxu0 }
 0x2d8   : > { %v1003_v33 = vpop.f32.mrf.mxu0 }
 0x2da   : > { %v423_v34 = vpop.f32.mrf.mxu0 }
 0x2dc   : > { %v1004_v35 = vpop.f32.mrf.mxu0 }
 0x349   : > { %v533_v39 = vpop.f32.mrf.mxu0 }
 0x34a   : > { %760 = vrot.lane.b32.xlu1 %v533_v39, %s1104_s22 }
 0x34b   : > { %v1015_v40 = vpop.f32.mrf.mxu0 }
 0x34d   : > { %v536_v42 = vpop.f32.mrf.mxu0 }
 0x34f   : > { %v1016_v43 = vpop.f32.mrf.mxu0 }
 0x351   : > { %v643_v44 = vpop.f32.mrf.mxu0 }
 0x352   : > { %764 = vrot.lane.b32.xlu0 %v643_v44, %s1105_s26 }
 0x353   : > { %v1027_v45 = vpop.f32.mrf.mxu0 }
 0x355   : > { %v646_v46 = vpop.f32.mrf.mxu0 }
 0x357   : > { %v1028_v47 = vpop.f32.mrf.mxu0 }
 0x359   : > { %v753_v48 = vpop.f32.mrf.mxu0 }
 0x35a   : > { %768 = vrot.lane.b32.xlu1 %v753_v48, %s1106_s27 }
 0x35b   : > { %v1039_v49 = vpop.f32.mrf.mxu0 }
 0x35d   : > { %v756_v0 = vpop.f32.mrf.mxu0 }
 0x35f   : > { %v1040_v50 = vpop.f32.mrf.mxu0 }
 0x3bc   : > { %v761_v51 = vpop.permute.xlu1 %760 }
 0x3bd   : > { %v771_v53 = vsel %vm319_vm1, %v420_v32, %v761_v51 }
 0x3c4   : > { %v765_v52 = vpop.permute.xlu0 %764 }
 0x3c5   : > { %v773_v54 = vsel %vm772_vm6, %v771_v53, %v765_v52 }
 0x3cc   : > { %v769_v55 = vpop.permute.xlu1 %768 }
 0x3cd   : > { %v775_v56 = vsel %vm774_vm7, %v773_v54, %v769_v55 }
 0x3ce   : > { %v776_v57 = vpack.c.bf16 %v775_v56, %v775_v56 }
 0x3d0   : > { %1050 = vmatmul.mubr.msk.bf16.vlgmr.msra.gmra.mxu1 %vm816_vm8, %v776_v57 }
 0x490   : > { %v854_v59 = vpop.f32.mrf.mxu1 }
 0x491   : > { %v855_v60 = vadd.f32 %v964_v58, %v854_v59 }
 0x492   : > { %v1051_v61 = vpop.f32.mrf.mxu1 }
 0x493   : > { %860 = vst.msk [vmem:[%s294_s8] sm:$0xff] %vm816_vm8, %v855_v60 }
 0x494   : > { %v857_v62 = vpop.f32.mrf.mxu1 }
 0x496   : > { %v1052_v63 = vpop.f32.mrf.mxu1 }
 0x497 PF: > { %s16_s21 = sadd.s32 1, %s1096_s21  }
 0x498   : > { %p13_p4 = scmp.ge.s32.totalorder %s16_s21, 4  }
 0x49a   :  { %15 = sbr.rel (!%p13_p4) target bundleno = 1 (0x1), region = 83 }

// kernel: forward.39
= control target key start
LH: loop header
LB: loop body
LE: loop exit
PB: predicated region body
PF: predicated region fallthrough
CT: control target
= control target key end

     0   :  { %v184_v0 = vmov 0.0   ;;  %vm185_vm0 = vmmov 0   ;;  %vm62_vm1 = vcmask 523264   ;;  %s230_s1 = inlined_call_operand.vmem [shape: bf16[64,128], index: 1, kind: input, shape index: {}]   ;;  %s231_s0 = inlined_call_operand.vmem [shape: bf16[16,64], index: 0, kind: input, shape index: {}]   ;;  %s232_s2 = inlined_call_operand.vmem [shape: f32[1,128], index: 2, kind: input, shape index: {}]   ;;  %s233_s3 = inlined_call_operand.vmem [shape: f32[16,128], index: 3, kind: output, shape index: {}]  }
   0x1   :  { %161 = vmatprep.subr.bf16.mxu0 %v184_v0  ;;  %v175_v1 = vld [vmem:[%s230_s1 + $0x18] sm:$0xff]   ;;  %169 = vmatprep.mubr.msk.bf16.mxu0 %vm185_vm0, %v184_v0  ;;  %v176_v2 = vld [vmem:[%s230_s1 + $0x10] sm:$0xff]   ;;  %v177_v3 = vld [vmem:[%s230_s1 + $0x8] sm:$0xff]  }
   0x2   :  { %162 = vmatpush3.bf16.msra.mxu0 %v175_v1  ;;  %v178_v4 = vld [vmem:[%s230_s1] sm:$0xff]  }
   0x3   :  { %163 = vmatprep.subr.bf16.mxu0 %v184_v0  ;;  %v179_v5 = vld [vmem:[%s231_s0] sm:$0xff]  }
   0x4   :  { %v155_v6 = vld [vmem:[%s232_s2] ss:$0 sm:$0xff] }
   0x6   :  { %164 = vmatpush3.bf16.msra.mxu0 %v176_v2 }
   0x7   :  { %165 = vmatprep.subr.bf16.mxu0 %v184_v0 }
   0xa   :  { %166 = vmatpush3.bf16.msra.mxu0 %v177_v3 }
   0xb   :  { %167 = vmatprep.subr.bf16.mxu0 %v184_v0 }
   0xe   :  { %168 = vmatpush3.bf16.msra.mxu0 %v178_v4 }
  0x11   :  { %170 = vmatmul.mubr.msk.bf16.vlgmr.msra.gmra.mxu0 %vm62_vm1, %v179_v5 }
  0xd1   :  { %v100_v7 = vpop.f32.mrf.mxu0 }
  0xd2   :  { %v123_v8 = vadd.f32 %v155_v6, %v100_v7 }
  0xd3   :  { %v171_v9 = vpop.f32.mrf.mxu0 }
  0xd4   :  { %v127_v10 = vmul.f32 0.044715, %v123_v8  ;;  %v125_v24 = vmul.f32 0.5, %v123_v8 }
  0xd5   :  { %v103_v11 = vpop.f32.mrf.mxu0 }
  0xd6   :  { %v129_v12 = vmul.f32 %v127_v10, %v123_v8  ;;  %v124_v13 = vadd.f32 %v155_v6, %v103_v11 }
  0xd7   :  { %v172_v14 = vpop.f32.mrf.mxu0 }
  0xd8   :  { %v131_v15 = vmul.f32 %v129_v12, %v123_v8  ;;  %v128_v16 = vmul.f32 0.044715, %v124_v13  ;;  %v126_v28 = vmul.f32 0.5, %v124_v13 }
  0xda   :  { %v133_v17 = vadd.f32 %v131_v15, %v123_v8  ;;  %v130_v18 = vmul.f32 %v128_v16, %v124_v13 }
  0xdc   :  { %v135_v19 = vmul.f32 0.7978846, %v133_v17  ;;  %v132_v20 = vmul.f32 %v130_v18, %v124_v13 }
  0xde   :  { %180 = vtanh.f32 %v135_v19  ;;  %v134_v21 = vadd.f32 %v132_v20, %v124_v13 }
  0xe0   :  { %v136_v22 = vmul.f32 0.7978846, %v134_v21 }
  0xe2   :  { %182 = vtanh.f32 %v136_v22 }
  0xeb   :  { %v181_v23 = vpop.eup %180 }
  0xec   :  { %v139_v25 = vadd.f32 1.0, %v181_v23 }
  0xee   :  { %v141_v26 = vmul.f32 %v139_v25, %v125_v24 }
  0xef   :  { %v183_v27 = vpop.eup %182 }
  0xf0   :  { %143 = vst [vmem:[%s233_s3] sm:$0xff] %v141_v26  ;;  %v140_v29 = vadd.f32 1.0, %v183_v27 }
  0xf2   :  { %v142_v30 = vmul.f32 %v140_v29, %v126_v28 }
  0xf4   :  { %144 = vst [vmem:[%s233_s3 + $0x8] sm:$0xff] %v142_v30 }

// kernel: forward.40
= control target key start
LH: loop header
LB: loop body
LE: loop exit
PB: predicated region body
PF: predicated region fallthrough
CT: control target
= control target key end

     0   :  { %vm19_vm0 = vcmask 523264   ;;  %v212_v0 = vmov 0.0   ;;  %vm213_vm1 = vmmov 0   ;;  %s276_s1 = inlined_call_operand.vmem [shape: bf16[128,64], index: 1, kind: input, shape index: {}]   ;;  %s277_s0 = inlined_call_operand.vmem [shape: bf16[16,128], index: 0, kind: input, shape index: {}]   ;;  %s278_s2 = inlined_call_operand.vmem [shape: f32[1,64], index: 2, kind: input, shape index: {}]   ;;  %s279_s3 = inlined_call_operand.vmem [shape: f32[16,64], index: 3, kind: output, shape index: {}]  }
   0x1   :  { %181 = vmatprep.subr.bf16.mxu0 %v212_v0  ;;  %v203_v1 = vld [vmem:[%s276_s1 + $0x38] sm:$0xff]   ;;  %197 = vmatprep.mubr.msk.bf16.mxu0 %vm213_vm1, %v212_v0  ;;  %20 = vst.msk [vmem:[#allocation2] sm:$0xff] %vm19_vm0, %v212_v0  ;;  %21 = vst.msk [vmem:[#allocation2 + $0x8] sm:$0xff] %vm19_vm0, %v212_v0  ;;  %v204_v2 = vld [vmem:[%s276_s1 + $0x30] sm:$0xff]  }
   0x2   :  { %182 = vmatpush3.bf16.msra.mxu0 %v203_v1  ;;  %v205_v3 = vld [vmem:[%s276_s1 + $0x28] sm:$0xff]   ;;  %v206_v4 = vld [vmem:[%s276_s1 + $0x20] sm:$0xff]   ;;  %v207_v5 = vld [vmem:[%s276_s1 + $0x18] sm:$0xff]  }
   0x3   :  { %183 = vmatprep.subr.bf16.mxu0 %v212_v0  ;;  %v208_v6 = vld [vmem:[%s276_s1 + $0x10] sm:$0xff]   ;;  %v209_v7 = vld [vmem:[%s276_s1 + $0x8] sm:$0xff]   ;;  %v210_v8 = vld [vmem:[%s276_s1] sm:$0xff]  }
   0x4   :  { %v211_v9 = vld [vmem:[%s277_s0] sm:$0xff]  }
   0x5   :  { %v171_v18 = vld [vmem:[%s278_s2] ss:$0 sm:$0xff] }
   0x6   :  { %184 = vmatpush3.bf16.msra.mxu0 %v204_v2 }
   0x7   :  { %185 = vmatprep.subr.bf16.mxu0 %v212_v0 }
   0x8   :  { %v22_v10 = vld [vmem:[#allocation2] sm:$0xff]  ;;  %v23_v14 = vld [vmem:[#allocation2 + $0x8] sm:$0xff] }
   0xa   :  { %186 = vmatpush3.bf16.msra.mxu0 %v205_v3 }
   0xb   :  { %187 = vmatprep.subr.bf16.mxu0 %v212_v0 }
   0xe   :  { %188 = vmatpush3.bf16.msra.mxu0 %v206_v4 }
   0xf   :  { %189 = vmatprep.subr.bf16.mxu0 %v212_v0 }
  0x12   :  { %190 = vmatpush3.bf16.msra.mxu0 %v207_v5 }
  0x13   :  { %191 = vmatprep.subr.bf16.mxu0 %v212_v0 }
  0x16   :  { %192 = vmatpush3.bf16.msra.mxu0 %v208_v6 }
  0x17   :  { %193 = vmatprep.subr.bf16.mxu0 %v212_v0 }
  0x1a   :  { %194 = vmatpush3.bf16.msra.mxu0 %v209_v7 }
  0x1b   :  { %195 = vmatprep.subr.bf16.mxu0 %v212_v0 }
  0x1e   :  { %196 = vmatpush3.bf16.msra.mxu0 %v210_v8 }
  0x21   :  { %198 = vmatmul.mubr.bf16.vlgmr.msra.gmra.mxu0 %v211_v9 }
  0xe1   :  { %v130_v11 = vpop.f32.mrf.mxu0 }
  0xe2   :  { %v137_v12 = vadd.f32 %v130_v11, %v22_v10 }
  0xe3   :  { %v199_v13 = vpop.f32.mrf.mxu0 }
  0xe4   :  { %140 = vst.msk [vmem:[#allocation2] sm:$0xff] %vm19_vm0, %v137_v12 }
  0xe5   :  { %v133_v15 = vpop.f32.mrf.mxu0 }
  0xe6   :  { %v138_v16 = vadd.f32 %v133_v15, %v23_v14 }
  0xe7   :  { %v200_v17 = vpop.f32.mrf.mxu0 }
  0xe8   :  { %141 = vst.msk [vmem:[#allocation2 + $0x8] sm:$0xff] %vm19_vm0, %v138_v16 }
  0xeb   :  { %v145_v19 = vld [vmem:[#allocation2] sm:$0xff] }
  0xec   :  { %v154_v20 = vadd.f32 %v171_v18, %v145_v19 }
  0xee   :  { %156 = vst.msk [vmem:[%s279_s3] sm:$0xff] %vm19_vm0, %v154_v20 }
  0xef   :  { %v146_v21 = vld [vmem:[#allocation2 + $0x8] sm:$0xff] }
  0xf0   :  { %v155_v22 = vadd.f32 %v171_v18, %v146_v21 }
  0xf2   :  { %157 = vst.msk [vmem:[%s279_s3 + $0x8] sm:$0xff] %vm19_vm0, %v155_v22 }

// kernel: forward.37
= control target key start
LH: loop header
LB: loop body
LE: loop exit
PB: predicated region body
PF: predicated region fallthrough
CT: control target
= control target key end

     0   :  { %s1135_s21 = smov 0   ;;  %s1250_s0 = inlined_call_operand.vmem [shape: f32[2,8,64], index: 0, kind: input, shape index: {}]   ;;  %s1251_s1 = inlined_call_operand.vmem [shape: f32[2,8,64], index: 1, kind: input, shape index: {}]   ;;  %s1252_s2 = inlined_call_operand.vmem [shape: f32[2,8,64], index: 2, kind: input, shape index: {}]   ;;  %s1253_s3 = inlined_call_operand.vmem [shape: f32[2,1,8], index: 3, kind: input, shape index: {}]   ;;  %s1254_s4 = inlined_call_operand.vmem [shape: bf16[64,64], index: 4, kind: input, shape index: {}]   ;;  %s1255_s5 = inlined_call_operand.vmem [shape: f32[1,64], index: 5, kind: input, shape index: {}]   ;;  %s1256_s6 = inlined_call_operand.vmem [shape: f32[2,8,64], index: 6, kind: output, shape index: {}]  }
   0x1 LB: > { %s940_s22 = sadd.s32 4294967295, %s1089_s21   ;;  %p944_p0 = scmp.ge.s32.totalorder %s1089_s21, 1  ;;  %s1089_s21 = sphi %s1135_s21, %s16_s21  }
   0x2   : > { %p237_p1 = scmp.lt.s32.totalorder %s1089_s21, 3 }
   0x4   : > { %p238_p2 = pnand %p944_p0, %p237_p1 }
   0x5   : > { %p276_p3 = scmp.lt.s32.totalorder (!%p238_p2), %s940_s22, 1  ;;  %s1093_s30 = smov (!%p238_p2), 112  }
   0x6   : > { %241 = sbr.rel (%p238_p2) target bundleno = 1175 (0x497), region = 44  ;;  %s1094_s7 = smov (!%p238_p2), 96  }
   0x7   : > { %s1095_s8 = smov (!%p238_p2), 80   ;;  %s1099_s27 = smov (!%p238_p2), 48  }
   0xb   : > { %v1091_v0 = vmov 0.0   ;;  %vm1092_vm0 = vmmov 0   ;;  %s1258_s22 = smov (!%p276_p3, %s940_s22), 1  ;;  %vm312_vm1 = vcmask 130048   ;;  %v303_v16 = vlaneseq }
   0xc   : > { %986 = vmatprep.subr.bf16.mxu0 %v1091_v0  ;;  %988 = vmatprep.mubr.msk.bf16.mxu0 %vm1092_vm0, %v1091_v0  ;;  %s1152_s23 = sshll.u32 %s1258_s22, 3  ;;  %s290_s11 = scalar_lea.vmem %s1253_s3, %s1258_s22  ;;  %v1096_v20 = vmov -1e+09   ;;  %vm359_vm3 = vcmask 64512   ;;  %vm375_vm4 = vcmask 1043456   ;;  %vm765_vm5 = vcmask 261120  }
   0xd   : > { %998 = vmatprep.subr.bf16.mxu1 %v1091_v0  ;;  %1000 = vmatprep.mubr.msk.bf16.mxu1 %vm1092_vm0, %v1091_v0  ;;  %s283_s26 = scalar_lea.vmem %s1251_s1, %s1152_s23  ;;  %s279_s29 = scalar_lea.vmem %s1250_s0, %s1152_s23  ;;  %v299_v17 = vld [vmem:[%s290_s11] sm:$0x1]  ;;  %v304_v18 = vshrl.u32 %v303_v16, 7  ;;  %vm767_vm6 = vcmask 392192   ;;  %vm809_vm7 = vcmask 523264  }
   0xe   : > { %v297_v1 = vld [vmem:[%s283_s26] sm:$0xff]  ;;  %vm300_vm2 = vcmp.gt.f32.partialorder %v299_v17, 0.5  ;;  %s287_s14 = scalar_lea.vmem %s1252_s2, %s1152_s23  ;;  %s1097_s22 = smov 16  }
   0xf   : > { %v296_v2 = vld [vmem:[%s279_s29] sm:$0xff]  ;;  %v310_v3 = vpack.c.bf16 %v297_v1, %v297_v1  ;;  %v305_v19 = vsub.s32 0, %v304_v18  ;;  %v301_v21 = vsel %vm300_vm2, 0.0, %v1096_v20  ;;  %s1098_s26 = smov 32  }
  0x10   : > { %v308_v4 = vmul.f32 0.25, %v296_v2  ;;  %v298_v52 = vld [vmem:[%s287_s14] sm:$0xff] }
  0x11   : > { %423 = vrot.lane.b32.xlu0 %v310_v3, %s1093_s30  ;;  %v317_v5 = vsel %vm312_vm1, %v310_v3, 0  ;;  %534 = vrot.lane.b32.xlu1 %v310_v3, %s1094_s7  ;;  %v306_v22 = vrot.slane %v301_v21, %v305_v19  ;;  %v311_v53 = vpack.c.bf16 %v298_v52, %v298_v52 }
  0x12   : > { %v309_v6 = vpack.c.bf16 %v308_v4, %v308_v4  ;;  %987 = vmatpush3.bf16.xpose.msra.mxu0 %v317_v5 }
  0x13   : > { %992 = vmatprep.subr.bf16.mxu0 %v1091_v0  ;;  %v377_v54 = vsel %vm375_vm4, %v311_v53, 0 }
  0x15   : > { %420 = vrot.lane.b32.xlu0 %v309_v6, %s1093_s30  ;;  %532 = vrot.lane.b32.xlu1 %v309_v6, %s1094_s7 }
  0x19   : > { %989 = vmatmul.mubr.msk.bf16.vlgmr.msra.gmra.mxu0 %vm312_vm1, %v309_v6  ;;  %644 = vrot.lane.b32.xlu0 %v310_v3, %s1095_s8 }
  0x1a   : > { %642 = vrot.lane.b32.xlu1 %v309_v6, %s1095_s8  ;;  %994 = vmatprep.mubr.msk.bf16.mxu0 %vm1092_vm0, %v1091_v0 }
  0x1b   : > { %993 = vmatpush3.bf16.msra.mxu0 %v377_v54 }
  0x1c   : > { %1004 = vmatprep.subr.bf16.mxu0 %v1091_v0 }
  0x83   : > { %v424_v7 = vpop.permute.xlu0 %423  ;;  %v535_v9 = vpop.permute.xlu1 %534 }
  0x84   : > { %v429_v8 = vsel %vm312_vm1, %v424_v7, 0  ;;  %v540_v11 = vsel %vm312_vm1, %v535_v9, 0 }
  0x85   : > { %999 = vmatpush3.bf16.xpose.msra.mxu1 %v429_v8 }
  0x86   : > { %1010 = vmatprep.subr.bf16.mxu1 %v1091_v0 }
  0x87   : > { %v421_v10 = vpop.permute.xlu0 %420  ;;  %v533_v13 = vpop.permute.xlu1 %532 }
  0x8b   : > { %v645_v12 = vpop.permute.xlu0 %644 }
  0x8c   : > { %1001 = vmatmul.mubr.msk.bf16.vlgmr.msra.gmra.mxu1 %vm312_vm1, %v421_v10  ;;  %v650_v14 = vsel %vm312_vm1, %v645_v12, 0  ;;  %v643_v15 = vpop.permute.xlu1 %642 }
  0x8d   : > { %1011 = vmatpush3.bf16.xpose.msra.mxu1 %v540_v11  ;;  %1012 = vmatprep.mubr.msk.bf16.mxu1 %vm1092_vm0, %v1091_v0 }
  0x8e   : > { %1022 = vmatprep.subr.bf16.mxu1 %v1091_v0 }
  0x94   : > { %1013 = vmatmul.mubr.msk.bf16.vlgmr.msra.gmra.mxu1 %vm312_vm1, %v533_v13 }
  0x95   : > { %1023 = vmatpush3.bf16.xpose.msra.mxu1 %v650_v14  ;;  %1024 = vmatprep.mubr.msk.bf16.mxu1 %vm1092_vm0, %v1091_v0 }
  0x96   : > { %1034 = vmatprep.subr.bf16.mxu1 %v1091_v0 }
  0x9c   : > { %1025 = vmatmul.mubr.msk.bf16.vlgmr.msra.gmra.mxu1 %vm312_vm1, %v643_v15 }
  0x9d   : > { %1042 = vmatprep.mubr.msk.bf16.mxu1 %vm1092_vm0, %v1091_v0 }
  0xd9   : > { %v353_v23 = vpop.f32.mrf.mxu0 }
  0xda   : > { %v354_v24 = vadd.f32 %v353_v23, %v306_v22 }
  0xdb   : > { %v990_v25 = vpop.f32.mrf.mxu0 }
  0xdc   : > { %v360_v26 = vsel %vm359_vm3, %v354_v24, -inf }
  0xdd   : > { %361 = vmax.xlane.f32.xlu0 %v360_v26  ;;  %v356_v27 = vpop.f32.mrf.mxu0 }
  0xdf   : > { %v991_v28 = vpop.f32.mrf.mxu0 }
 0x14c   : > { %v465_v29 = vpop.f32.mrf.mxu1 }
 0x14d   : > { %v466_v30 = vadd.f32 %v465_v29, %v306_v22 }
 0x14e   : > { %v1002_v31 = vpop.f32.mrf.mxu1 }
 0x14f   : > { %v471_v32 = vsel %vm359_vm3, %v466_v30, -inf }
 0x150   : > { %472 = vmax.xlane.f32.xlu1 %v471_v32  ;;  %v468_v33 = vpop.f32.mrf.mxu1 }
 0x151   : > { %v1063_v33 = vld [vmem:[%s1254_s4 + $0x18] sm:$0xff]  }
 0x152   : > { %v1003_v34 = vpop.f32.mrf.mxu1  ;;  %1035 = vmatpush3.bf16.msra.mxu1 %v1063_v33 }
 0x153   : > { %1036 = vmatprep.subr.bf16.mxu1 %v1091_v0  ;;  %v1064_v34 = vld [vmem:[%s1254_s4 + $0x10] sm:$0xff]  }
 0x154   : > { %v576_v35 = vpop.f32.mrf.mxu1 }
 0x155   : > { %v577_v36 = vadd.f32 %v576_v35, %v306_v22  ;;  %v1065_v35 = vld [vmem:[%s1254_s4 + $0x8] sm:$0xff]  }
 0x156   : > { %v1014_v37 = vpop.f32.mrf.mxu1  ;;  %1037 = vmatpush3.bf16.msra.mxu1 %v1064_v34 }
 0x157   : > { %v582_v38 = vsel %vm359_vm3, %v577_v36, -inf  ;;  %1038 = vmatprep.subr.bf16.mxu1 %v1091_v0 }
 0x158   : > { %v579_v39 = vpop.f32.mrf.mxu1  ;;  %583 = vmax.xlane.f32.xlu0 %v582_v38  ;;  %v1066_v38 = vld [vmem:[%s1254_s4] sm:$0xff]  }
 0x15a   : > { %v1015_v40 = vpop.f32.mrf.mxu1  ;;  %1039 = vmatpush3.bf16.msra.mxu1 %v1065_v35 }
 0x15b   : > { %1040 = vmatprep.subr.bf16.mxu1 %v1091_v0 }
 0x15c   : > { %v686_v41 = vpop.f32.mrf.mxu1 }
 0x15d   : > { %v687_v42 = vadd.f32 %v686_v41, %v306_v22 }
 0x15e   : > { %v1026_v43 = vpop.f32.mrf.mxu1  ;;  %1041 = vmatpush3.bf16.msra.mxu1 %v1066_v38 }
 0x15f   : > { %v692_v44 = vsel %vm359_vm3, %v687_v42, -inf }
 0x160   : > { %v689_v45 = vpop.f32.mrf.mxu1  ;;  %693 = vmax.xlane.f32.xlu0 %v692_v44 }
 0x162   : > { %v1027_v46 = vpop.f32.mrf.mxu1 }
 0x166   : > { %v362_v47 = vpop.xlane.xlu0 %361 }
 0x167   : > { %v363_v48 = vsub.f32 %v354_v24, %v362_v47 }
 0x169   : > { %v364_v49 = vmul.f32 1.442695, %v363_v48 }
 0x16b   : > { %1067 = vpow2.f32 %v364_v49 }
 0x178   : > { %v1068_v50 = vpop.eup %1067 }
 0x179   : > { %v366_v51 = vsel %vm359_vm3, %v1068_v50, 0.0 }
 0x17a   : > { %367 = vadd.xlane.f32.xlu1 %v366_v51 }
 0x18b   : > { %484 = vrot.lane.b32.xlu1 %v311_v53, %s1093_s30 }
 0x1d9   : > { %v473_v55 = vpop.xlane.xlu1 %472 }
 0x1da   : > { %v474_v56 = vsub.f32 %v466_v30, %v473_v55  ;;  %v957_v55 = vld [vmem:[%s1255_s5] ss:$0 sm:$0xff] }
 0x1dc   : > { %v475_v57 = vmul.f32 1.442695, %v474_v56 }
 0x1de   : > { %1069 = vpow2.f32 %v475_v57 }
 0x1e1   : > { %v584_v58 = vpop.xlane.xlu0 %583 }
 0x1e2   : > { %v585_v59 = vsub.f32 %v577_v36, %v584_v58 }
 0x1e4   : > { %v586_v60 = vmul.f32 1.442695, %v585_v59 }
 0x1e6   : > { %1071 = vpow2.f32 %v586_v60 }
 0x1e9   : > { %v694_v61 = vpop.xlane.xlu0 %693 }
 0x1ea   : > { %v695_v62 = vsub.f32 %v687_v42, %v694_v61 }
 0x1eb   : > { %v1070_v63 = vpop.eup %1069 }
 0x1ec   : > { %v696_v1 = vmul.f32 1.442695, %v695_v62  ;;  %v477_v2 = vsel %vm359_vm3, %v1070_v63, 0.0 }
 0x1ed   : > { %478 = vadd.xlane.f32.xlu0 %v477_v2 }
 0x1ee   : > { %1073 = vpow2.f32 %v696_v1 }
 0x1f3   : > { %v1072_v3 = vpop.eup %1071 }
 0x1f4   : > { %v588_v4 = vsel %vm359_vm3, %v1072_v3, 0.0 }
 0x1f5   : > { %589 = vadd.xlane.f32.xlu1 %v588_v4 }
 0x1fb   : > { %v1074_v5 = vpop.eup %1073 }
 0x1fc   : > { %v698_v6 = vsel %vm359_vm3, %v1074_v5, 0.0 }
 0x1fd   : > { %699 = vadd.xlane.f32.xlu0 %v698_v6 }
 0x203   : > { %v368_v7 = vpop.xlane.xlu1 %367 }
 0x204   : > { %1075 = vrcp.f32 %v368_v7 }
 0x206   : > { %704 = vrot.lane.b32.xlu1 %v311_v53, %s1095_s8  ;;  %s294_s8 = scalar_lea.vmem %s1256_s6, %s1152_s23 }
 0x207   : > { %v485_v9 = vpop.permute.xlu1 %484 }
 0x208   : > { %v490_v12 = vsel %vm375_vm4, %v485_v9, 0 }
 0x211   : > { %v1076_v8 = vpop.eup %1075 }
 0x212   : > { %v370_v10 = vmul.f32 %v1076_v8, %v1068_v50 }
 0x213   : > { %594 = vrot.lane.b32.xlu0 %v311_v53, %s1094_s7 }
 0x214   : > { %v371_v11 = vpack.c.bf16 %v370_v10, %v370_v10 }
 0x216   : > { %995 = vmatmul.mubr.msk.bf16.vlgmr.msra.gmra.mxu0 %vm359_vm3, %v371_v11 }
 0x217   : > { %1005 = vmatpush3.bf16.msra.mxu0 %v490_v12  ;;  %1006 = vmatprep.mubr.msk.bf16.mxu0 %vm1092_vm0, %v1091_v0 }
 0x218   : > { %1016 = vmatprep.subr.bf16.mxu0 %v1091_v0 }
 0x276   : > { %v479_v13 = vpop.xlane.xlu0 %478 }
 0x277   : > { %1077 = vrcp.f32 %v479_v13 }
 0x27e   : > { %v590_v14 = vpop.xlane.xlu1 %589 }
 0x27f   : > { %1079 = vrcp.f32 %v590_v14 }
 0x282   : > { %v705_v22 = vpop.permute.xlu1 %704 }
 0x283   : > { %v710_v25 = vsel %vm375_vm4, %v705_v22, 0 }
 0x284   : > { %v1078_v15 = vpop.eup %1077 }
 0x285   : > { %v481_v16 = vmul.f32 %v1078_v15, %v1070_v63 }
 0x286   : > { %v700_v17 = vpop.xlane.xlu0 %699 }
 0x287   : > { %1081 = vrcp.f32 %v700_v17  ;;  %v482_v18 = vpack.c.bf16 %v481_v16, %v481_v16 }
 0x289   : > { %1007 = vmatmul.mubr.msk.bf16.vlgmr.msra.gmra.mxu0 %vm359_vm3, %v482_v18 }
 0x28a   : > { %v595_v19 = vpop.permute.xlu0 %594  ;;  %1018 = vmatprep.mubr.msk.bf16.mxu0 %vm1092_vm0, %v1091_v0 }
 0x28b   : > { %v600_v20 = vsel %vm375_vm4, %v595_v19, 0 }
 0x28c   : > { %v1080_v21 = vpop.eup %1079  ;;  %1017 = vmatpush3.bf16.msra.mxu0 %v600_v20 }
 0x28d   : > { %v592_v23 = vmul.f32 %v1080_v21, %v1072_v3  ;;  %1028 = vmatprep.subr.bf16.mxu0 %v1091_v0 }
 0x28f   : > { %v593_v24 = vpack.c.bf16 %v592_v23, %v592_v23 }
 0x291   : > { %1019 = vmatmul.mubr.msk.bf16.vlgmr.msra.gmra.mxu0 %vm359_vm3, %v593_v24 }
 0x292   : > { %1029 = vmatpush3.bf16.msra.mxu0 %v710_v25  ;;  %1030 = vmatprep.mubr.msk.bf16.mxu0 %vm1092_vm0, %v1091_v0 }
 0x294   : > { %v1082_v26 = vpop.eup %1081 }
 0x295   : > { %v702_v27 = vmul.f32 %v1082_v26, %v1074_v5 }
 0x297   : > { %v703_v28 = vpack.c.bf16 %v702_v27, %v702_v27 }
 0x299   : > { %1031 = vmatmul.mubr.msk.bf16.vlgmr.msra.gmra.mxu0 %vm359_vm3, %v703_v28 }
 0x2d6   : > { %v413_v29 = vpop.f32.mrf.mxu0 }
 0x2d8   : > { %v996_v30 = vpop.f32.mrf.mxu0 }
 0x2da   : > { %v416_v31 = vpop.f32.mrf.mxu0 }
 0x2dc   : > { %v997_v32 = vpop.f32.mrf.mxu0 }
 0x349   : > { %v526_v36 = vpop.f32.mrf.mxu0 }
 0x34a   : > { %753 = vrot.lane.b32.xlu1 %v526_v36, %s1097_s22 }
 0x34b   : > { %v1008_v37 = vpop.f32.mrf.mxu0 }
 0x34d   : > { %v529_v39 = vpop.f32.mrf.mxu0 }
 0x34f   : > { %v1009_v40 = vpop.f32.mrf.mxu0 }
 0x351   : > { %v636_v41 = vpop.f32.mrf.mxu0 }
 0x352   : > { %757 = vrot.lane.b32.xlu0 %v636_v41, %s1098_s26 }
 0x353   : > { %v1020_v42 = vpop.f32.mrf.mxu0 }
 0x355   : > { %v639_v43 = vpop.f32.mrf.mxu0 }
 0x357   : > { %v1021_v44 = vpop.f32.mrf.mxu0 }
 0x359   : > { %v746_v45 = vpop.f32.mrf.mxu0 }
 0x35a   : > { %761 = vrot.lane.b32.xlu1 %v746_v45, %s1099_s27 }
 0x35b   : > { %v1032_v46 = vpop.f32.mrf.mxu0 }
 0x35d   : > { %v749_v0 = vpop.f32.mrf.mxu0 }
 0x35f   : > { %v1033_v47 = vpop.f32.mrf.mxu0 }
 0x3bc   : > { %v754_v48 = vpop.permute.xlu1 %753 }
 0x3bd   : > { %v764_v50 = vsel %vm312_vm1, %v413_v29, %v754_v48 }
 0x3c4   : > { %v758_v49 = vpop.permute.xlu0 %757 }
 0x3c5   : > { %v766_v51 = vsel %vm765_vm5, %v764_v50, %v758_v49 }
 0x3cc   : > { %v762_v52 = vpop.permute.xlu1 %761 }
 0x3cd   : > { %v768_v53 = vsel %vm767_vm6, %v766_v51, %v762_v52 }
 0x3ce   : > { %v769_v54 = vpack.c.bf16 %v768_v53, %v768_v53 }
 0x3d0   : > { %1043 = vmatmul.mubr.msk.bf16.vlgmr.msra.gmra.mxu1 %vm809_vm7, %v769_v54 }
 0x490   : > { %v847_v56 = vpop.f32.mrf.mxu1 }
 0x491   : > { %v848_v57 = vadd.f32 %v957_v55, %v847_v56 }
 0x492   : > { %v1044_v58 = vpop.f32.mrf.mxu1 }
 0x493   : > { %853 = vst.msk [vmem:[%s294_s8] sm:$0xff] %vm809_vm7, %v848_v57 }
 0x494   : > { %v850_v59 = vpop.f32.mrf.mxu1 }
 0x496   : > { %v1045_v60 = vpop.f32.mrf.mxu1 }
 0x497 PF: > { %s16_s21 = sadd.s32 1, %s1089_s21  }
 0x498   : > { %p13_p4 = scmp.ge.s32.totalorder %s16_s21, 4  }
 0x49a   :  { %15 = sbr.rel (!%p13_p4) target bundleno = 1 (0x1), region = 83 }

// kernel: forward.53
= control target key start
LH: loop header
LB: loop body
LE: loop exit
PB: predicated region body
PF: predicated region fallthrough
CT: control target
= control target key end

     0   :  { %v162_v0 = vmov 0.0   ;;  %vm163_vm0 = vmmov 0   ;;  %vm62_vm1 = vcmask 523264   ;;  %s208_s1 = inlined_call_operand.vmem [shape: bf16[64,128], index: 1, kind: input, shape index: {}]   ;;  %s209_s0 = inlined_call_operand.vmem [shape: bf16[16,64], index: 0, kind: input, shape index: {}]   ;;  %s210_s2 = inlined_call_operand.vmem [shape: f32[1,128], index: 2, kind: input, shape index: {}]   ;;  %s211_s3 = inlined_call_operand.vmem [shape: f32[16,128], index: 3, kind: output, shape index: {}]  }
   0x1   :  { %143 = vmatprep.subr.bf16.mxu0 %v162_v0  ;;  %v157_v1 = vld [vmem:[%s208_s1 + $0x18] sm:$0xff]   ;;  %151 = vmatprep.mubr.msk.bf16.mxu0 %vm163_vm0, %v162_v0  ;;  %v158_v2 = vld [vmem:[%s208_s1 + $0x10] sm:$0xff]   ;;  %v159_v3 = vld [vmem:[%s208_s1 + $0x8] sm:$0xff]  }
   0x2   :  { %144 = vmatpush3.bf16.msra.mxu0 %v157_v1  ;;  %v160_v4 = vld [vmem:[%s208_s1] sm:$0xff]  }
   0x3   :  { %145 = vmatprep.subr.bf16.mxu0 %v162_v0  ;;  %v161_v5 = vld [vmem:[%s209_s0] sm:$0xff]  }
   0x4   :  { %v137_v6 = vld [vmem:[%s210_s2] ss:$0 sm:$0xff] }
   0x6   :  { %146 = vmatpush3.bf16.msra.mxu0 %v158_v2 }
   0x7   :  { %147 = vmatprep.subr.bf16.mxu0 %v162_v0 }
   0xa   :  { %148 = vmatpush3.bf16.msra.mxu0 %v159_v3 }
   0xb   :  { %149 = vmatprep.subr.bf16.mxu0 %v162_v0 }
   0xe   :  { %150 = vmatpush3.bf16.msra.mxu0 %v160_v4 }
  0x11   :  { %152 = vmatmul.mubr.msk.bf16.vlgmr.msra.gmra.mxu0 %vm62_vm1, %v161_v5 }
  0xd1   :  { %v100_v7 = vpop.f32.mrf.mxu0 }
  0xd2   :  { %v123_v8 = vadd.f32 %v137_v6, %v100_v7 }
  0xd3   :  { %v153_v9 = vpop.f32.mrf.mxu0 }
  0xd4   :  { %125 = vst [vmem:[%s211_s3] sm:$0xff] %v123_v8 }
  0xd5   :  { %v103_v10 = vpop.f32.mrf.mxu0 }
  0xd6   :  { %v124_v11 = vadd.f32 %v137_v6, %v103_v10 }
  0xd7   :  { %v154_v12 = vpop.f32.mrf.mxu0 }
  0xd8   :  { %126 = vst [vmem:[%s211_s3 + $0x8] sm:$0xff] %v124_v11 }

// kernel: forward.69
= control target key start
LH: loop header
LB: loop body
LE: loop exit
PB: predicated region body
PF: predicated region fallthrough
CT: control target
= control target key end

     0   :  { %v200_v1 = vmov 0.0   ;;  %vm201_vm0 = vmmov 0   ;;  %s246_s0 = inlined_call_operand.vmem [shape: bf16[16,64], index: 0, kind: input, shape index: {}]   ;;  %s247_s1 = inlined_call_operand.vmem [shape: bf16[64,128], index: 1, kind: input, shape index: {}]   ;;  %s248_s2 = inlined_call_operand.vmem [shape: f32[1,128], index: 2, kind: input, shape index: {}]   ;;  %s249_s3 = inlined_call_operand.hbm [shape: f32[16,128], index: 3, kind: output, shape index: {}]  }
   0x1   :  { %v173_v0 = vld [vmem:[%s247_s1 + $0x18] sm:$0xff]   ;;  %156 = vmatprep.subr.bf16.mxu0 %v200_v1  ;;  %v174_v2 = vld [vmem:[%s247_s1 + $0x10] sm:$0xff]   ;;  %164 = vmatprep.mubr.msk.bf16.mxu0 %vm201_vm0, %v200_v1 }
   0x2   :  { %157 = vmatpush3.bf16.msra.mxu0 %v173_v0 }
   0x3   :  { %158 = vmatprep.subr.bf16.mxu0 %v200_v1 }
   0x4   :  { %8 = vsyncpa [#allocation4], 0  ;;  %v175_v3 = vld [vmem:[%s247_s1 + $0x8] sm:$0xff]   ;;  %v176_v4 = vld [vmem:[%s247_s1] sm:$0xff]   ;;  %vm63_vm1 = vcmask 523264   ;;  %s202_s24 = smov [#allocation3]  }
   0x5   :  { %v177_v5 = vld [vmem:[%s246_s0] sm:$0xff]   ;;  %s133_s25 = sshll.u32 %s202_s24, 4  ;;  %s134_s25 = int_to_ptr.vmem [resolvable:$true] %s133_s25 }
   0x6   :  { %159 = vmatpush3.bf16.msra.mxu0 %v174_v2  ;;  %v150_v6 = vld [vmem:[%s248_s2] ss:$0 sm:$0xff]  ;;  %s178_s1 = scalar_lea.vmem %s134_s25, 256  ;;  %p183_p1 = scmp.lt.s32.totalorder %s134_s25, %s134_s25 }
   0x7   :  { %160 = vmatprep.subr.bf16.mxu0 %v200_v1  ;;  %p179_p0 = scmp.ne.s32.totalorder %s134_s25, %s178_s1  ;;  %p184_p2 = scmp.lt.s32.totalorder %s178_s1, %s178_s1 }
   0x9   :  { %p185_p3 = por %p184_p2, %p183_p1 }
   0xa   :  { %161 = vmatpush3.bf16.msra.mxu0 %v175_v3 }
   0xb   :  { %162 = vmatprep.subr.bf16.mxu0 %v200_v1  ;;  %p186_p4 = pnand %p185_p3, %p179_p0 }
   0xe   :  { %163 = vmatpush3.bf16.msra.mxu0 %v176_v4 }
  0x11   :  { %165 = vmatmul.mubr.msk.bf16.vlgmr.msra.gmra.mxu0 %vm63_vm1, %v177_v5 }
  0xd1   :  { %v101_v7 = vpop.f32.mrf.mxu0 }
  0xd2   :  { %v124_v8 = vadd.f32 %v150_v6, %v101_v7 }
  0xd3   :  { %v166_v9 = vpop.f32.mrf.mxu0 }
  0xd4   :  { %126 = vst [vmem:[#allocation3] sm:$0xff] %v124_v8 }
  0xd5   :  { %v104_v10 = vpop.f32.mrf.mxu0 }
  0xd6   :  { %v125_v11 = vadd.f32 %v150_v6, %v104_v10 }
  0xd7   :  { %v167_v12 = vpop.f32.mrf.mxu0 }
  0xd8   :  { %127 = vst [vmem:[#allocation3 + $0x8] sm:$0xff] %v125_v11 }
  0xd9   :  { %189 = shalt.err (!%p186_p4)
}
  0xda   :  { %s203_s0 = smov 128   ;;  %s204_s2 = smov 8  }
  0xdb   :  { %139 = dma.vmem_to_hbm [thread:$0]  %s134_s25, 256, %s249_s3, [#allocation4], %s203_s0, %s203_s0, %s204_s2  }
  0xdc   :  { %198 = dma.done.wait [#allocation4], 256  }
  0xdd   :  { %199 = vsyncadd [#allocation4], 4294967040 }
  0xde   :  { %143 = vsyncpa [#allocation4], 1 }

</bundles_post_ra>
